<compile_context>
chip_gen: v7x
topology: tpu7x:2x2x1
jax: 0.10.0
libtpu: 0.0.40
codegen_flags: <defaults>
</compile_context>

<pallas_src>
import math
import functools

import jax
import jax.numpy as jnp
from jax.experimental import pallas as pl
from jax.experimental.pallas import tpu as pltpu


def _round_up(v, m):
    return ((v + m - 1) // m) * m


# ----------------------- fused encoder-layer kernel -------------------------

def _encoder_layer_kernel(x_ref, wqkv_ref, bqkv_ref, wo_ref, bo_ref,
                          g1_ref, b1_ref, w1_ref, bf1_ref, w2_ref, bf2_ref,
                          g2_ref, b2_ref, o_ref, attn_ref, *, nhead, eps):
    """One post-norm nn.TransformerEncoderLayer (ReLU act, no masks) for a block
    of `BB` batch elements. x/o blocks: (BB, S, D); matmul weights bf16; biases,
    LN params and all elementwise math f32."""
    BB, S, D = x_ref.shape
    N = BB * S
    Dh = D // nhead
    scale = 1.0 / math.sqrt(Dh)

    x3 = x_ref[...].astype(jnp.float32)                       # (BB, S, D)
    x = x3.reshape(N, D)                                      # flatten rows -> bigger MXU M

    # ---- QKV projection (bf16 MXU operands, f32 accumulate) ----
    qkv = (jnp.dot(x.astype(jnp.bfloat16), wqkv_ref[...],
                   preferred_element_type=jnp.float32)
           + bqkv_ref[...])                                   # (N, 3D) f32
    qkv3 = qkv.reshape(BB, S, 3 * D)

    # ---- attention: per-head, batched over the BB batch elements in this block;
    #      head outputs written into VMEM scratch (no concat relayout) ----
    for h in range(nhead):
        q_h = qkv3[:, :, h * Dh:(h + 1) * Dh].astype(jnp.bfloat16)            # (BB,S,Dh)
        k_h = qkv3[:, :, D + h * Dh:D + (h + 1) * Dh].astype(jnp.bfloat16)
        v_h = qkv3[:, :, 2 * D + h * Dh:2 * D + (h + 1) * Dh].astype(jnp.bfloat16)
        s = jnp.einsum("bqd,bkd->bqk", q_h, k_h,
                       preferred_element_type=jnp.float32) * scale            # (BB,S,S)
        m = jnp.max(s, axis=-1, keepdims=True)
        p = jnp.exp(s - m)
        denom = jnp.sum(p, axis=-1, keepdims=True)
        p = p * pl.reciprocal(denom, approx=True)             # EUP, not VALU divide
        attn_ref[:, :, h * Dh:(h + 1) * Dh] = jnp.einsum(
            "bqk,bkd->bqd", p.astype(jnp.bfloat16), v_h,
            preferred_element_type=jnp.float32)                               # (BB,S,Dh)

    attn = attn_ref[...].reshape(N, D)

    # ---- attention output projection ----
    attn = (jnp.dot(attn.astype(jnp.bfloat16), wo_ref[...],
                    preferred_element_type=jnp.float32)
            + bo_ref[...])                                    # (N, D)

    # ---- residual add + LayerNorm 1 (f32) ----
    z = x + attn
    mean = jnp.mean(z, axis=-1, keepdims=True)
    var = jnp.mean((z - mean) ** 2, axis=-1, keepdims=True)
    x1 = (z - mean) * jax.lax.rsqrt(var + eps) * g1_ref[...] + b1_ref[...]

    # ---- feed-forward (ReLU) ----
    h1 = (jnp.dot(x1.astype(jnp.bfloat16), w1_ref[...],
                  preferred_element_type=jnp.float32)
          + bf1_ref[...])                                     # (N, F)
    h1 = jnp.maximum(h1, 0.0)
    ff = (jnp.dot(h1.astype(jnp.bfloat16), w2_ref[...],
                  preferred_element_type=jnp.float32)
          + bf2_ref[...])                                     # (N, D)

    # ---- residual add + LayerNorm 2 (f32) ----
    z2 = x1 + ff
    mean2 = jnp.mean(z2, axis=-1, keepdims=True)
    var2 = jnp.mean((z2 - mean2) ** 2, axis=-1, keepdims=True)
    y = (z2 - mean2) * jax.lax.rsqrt(var2 + eps) * g2_ref[...] + b2_ref[...]

    o_ref[...] = y.reshape(BB, S, D).astype(o_ref.dtype)


def _weight_spec(shape, single_buffer):
    """BlockSpec for a weight/bias that is identical for every grid step.
    Single-buffered when supported (the block never changes, so the second
    pipeline buffer is pure VMEM waste)."""
    index_map = lambda b: (0,) * len(shape)
    if single_buffer:
        try:
            return pl.BlockSpec(shape, index_map, pipeline_mode=pl.Buffered(1))
        except (AttributeError, TypeError):
            pass
    return pl.BlockSpec(shape, index_map)


def _pick_block_b(batch, seq, target_rows=256):
    """Batch-block size: ~target_rows rows per grid step (MXU-friendly M for the
    projections/FFN), but keep >=2 grid steps when batch > 1 so both v7x TCs
    get work."""
    bb = max(1, min(batch, target_rows // max(seq, 1)))
    while batch % bb:
        bb -= 1
    if batch > 1 and batch // bb < 2:
        bb = max(1, bb // 2)
        while batch % bb:
            bb -= 1
    return bb


def _encoder_vmem_budget(bb, s, d, f, nhead, single_buffer):
    wbuf = 1 if single_buffer else 2
    weights = 2 * (4 * d * d + 2 * d * f) * wbuf              # bf16 Wqkv, Wo, Wff1, Wff2
    smalls = 4 * (9 * d + f) * wbuf                           # f32 biases + LN params
    io = 2 * 2 * (2 * bb * s * d)                             # bf16 x/out blocks, dbl-buffered
    scratch = 4 * bb * s * d                                  # f32 attention scratch
    temps = 4 * bb * s * (4 * d + f) + 4 * bb * nhead * s * s  # in-kernel temporaries
    total = weights + smalls + io + scratch + 2 * temps + (2 << 20)
    return min(total, 64 << 20)                               # cap at v7x physical VMEM


def encoder_layer(x, layer, nhead, *, eps=1e-5, single_buffer_weights=True):
    """Fused post-norm TransformerEncoderLayer. x: (B, S, D) bf16 -> (B, S, D) bf16."""
    B, S, D = x.shape
    F = layer["ff1_w"].shape[1]
    BB = _pick_block_b(B, S)
    grid = (B // BB,)
    row = lambda b: (b, 0, 0)

    in_specs = [pl.BlockSpec((BB, S, D), row)]
    for shape in [(D, 3 * D), (1, 3 * D), (D, D), (1, D), (1, D), (1, D),
                  (D, F), (1, F), (F, D), (1, D), (1, D), (1, D)]:
        in_specs.append(_weight_spec(shape, single_buffer_weights))

    return pl.pallas_call(
        functools.partial(_encoder_layer_kernel, nhead=nhead, eps=eps),
        out_shape=jax.ShapeDtypeStruct((B, S, D), jnp.bfloat16),
        grid_spec=pltpu.PrefetchScalarGridSpec(
            num_scalar_prefetch=0,
            grid=grid,
            in_specs=in_specs,
            out_specs=pl.BlockSpec((BB, S, D), row),
            scratch_shapes=[pltpu.VMEM((BB, S, D), jnp.float32)],
        ),
        compiler_params=pltpu.CompilerParams(
            dimension_semantics=("parallel",),   # batch blocks shard across TCs on v7x
            vmem_limit_bytes=_encoder_vmem_budget(BB, S, D, F, nhead,
                                                  single_buffer_weights),
        ),
    )(x,
      layer["in_proj_w"], layer["in_proj_b"],
      layer["out_proj_w"], layer["out_proj_b"],
      layer["ln1_g"], layer["ln1_b"],
      layer["ff1_w"], layer["ff1_b"],
      layer["ff2_w"], layer["ff2_b"],
      layer["ln2_g"], layer["ln2_b"])


# ---------------------- lane-dense output linear kernel ----------------------

def _linear_kernel(x_ref, w_ref, b_ref, o_ref):
    y = (jnp.dot(x_ref[...].astype(jnp.bfloat16), w_ref[...],
                 preferred_element_type=jnp.float32)
         + b_ref[...])
    o_ref[...] = y


def output_linear(x, w, b, *, block_m=256, block_n=256):
    """x: (M, K) activations, w: (K, Np) bf16 (vocab pre-padded to a multiple of
    128 at init), b: (1, Np) f32 -> (M, Np) f32 logits (caller slices pad off).
    Grid is (vocab tiles OUTERMOST, row tiles innermost) so each weight tile is
    DMA'd exactly once."""
    M, K = x.shape
    Np = w.shape[1]

    bn = block_n if Np % block_n == 0 else 128
    bm = min(block_m, M)
    if M % bm:
        bm = math.gcd(M, bm)
        if bm % 8 and bm != M:
            bm = M                     # awkward row count: one full-M block
    grid = (Np // bn, M // bm)

    vmem = 2 * (bm * K * x.dtype.itemsize + K * bn * 2 + 4 * bn + 4 * bm * bn) + (1 << 20)

    return pl.pallas_call(
        _linear_kernel,
        out_shape=jax.ShapeDtypeStruct((M, Np), jnp.float32),
        grid_spec=pltpu.PrefetchScalarGridSpec(
            num_scalar_prefetch=0,
            grid=grid,
            in_specs=[
                pl.BlockSpec((bm, K), lambda j, i: (i, 0)),
                pl.BlockSpec((K, bn), lambda j, i: (0, j)),   # constant over inner axis
                pl.BlockSpec((1, bn), lambda j, i: (0, j)),
            ],
            out_specs=pl.BlockSpec((bm, bn), lambda j, i: (i, j)),
        ),
        compiler_params=pltpu.CompilerParams(
            dimension_semantics=("parallel", "parallel"),
            vmem_limit_bytes=min(max(vmem, 8 << 20), 64 << 20),
        ),
    )(x, w, b)


# ------------------------- parameter initialization -------------------------

def _xavier_uniform(key, shape):
    fan_in, fan_out = shape[0], shape[1]
    bound = math.sqrt(6.0 / (fan_in + fan_out))
    return jax.random.uniform(key, shape, jnp.float32, -bound, bound)


def init_params(key, vocab_size, d_model, nhead, num_layers, dim_feedforward):
    """PyTorch-equivalent f32 parameters (xavier_uniform on >1-dim params)."""
    keys = jax.random.split(key, 2 + num_layers * 4)
    params = {
        "embedding": _xavier_uniform(keys[0], (vocab_size, d_model)),
        "out_w": _xavier_uniform(keys[1], (d_model, vocab_size)),
        "out_b": jnp.zeros((vocab_size,), jnp.float32),
        "layers": [],
    }
    for li in range(num_layers):
        k0, k1, k2, k3 = keys[2 + 4 * li: 2 + 4 * li + 4]
        params["layers"].append({
            "in_proj_w": _xavier_uniform(k0, (d_model, 3 * d_model)),
            "in_proj_b": jnp.zeros((3 * d_model,), jnp.float32),
            "out_proj_w": _xavier_uniform(k1, (d_model, d_model)),
            "out_proj_b": jnp.zeros((d_model,), jnp.float32),
            "ln1_g": jnp.ones((d_model,), jnp.float32),
            "ln1_b": jnp.zeros((d_model,), jnp.float32),
            "ff1_w": _xavier_uniform(k2, (d_model, dim_feedforward)),
            "ff1_b": jnp.zeros((dim_feedforward,), jnp.float32),
            "ff2_w": _xavier_uniform(k3, (dim_feedforward, d_model)),
            "ff2_b": jnp.zeros((d_model,), jnp.float32),
            "ln2_g": jnp.ones((d_model,), jnp.float32),
            "ln2_b": jnp.zeros((d_model,), jnp.float32),
        })
    return params


def prepare_params(raw, d_model):
    """One-time preprocessing (hoisted out of the forward pass):
       - fold sqrt(d_model) into the embedding table,
       - cast matmul weights to bf16 (HBM-resident bf16),
       - reshape biases / LN params to (1, X) kernel layout,
       - pad the output vocab to a lane-dense multiple of 128 once."""
    scale = math.sqrt(d_model)
    prepped = {"embedding": raw["embedding"] * scale}

    vocab = raw["out_w"].shape[1]
    vocab_p = _round_up(vocab, 128)
    out_w, out_b = raw["out_w"], raw["out_b"]
    if vocab_p != vocab:
        out_w = jnp.pad(out_w, ((0, 0), (0, vocab_p - vocab)))
        out_b = jnp.pad(out_b, (0, vocab_p - vocab))
    prepped["out_w"] = out_w.astype(jnp.bfloat16)
    prepped["out_b"] = out_b.reshape(1, vocab_p)

    prepped["layers"] = []
    for l in raw["layers"]:
        prepped["layers"].append({
            "in_proj_w": l["in_proj_w"].astype(jnp.bfloat16),
            "in_proj_b": l["in_proj_b"].reshape(1, -1),
            "out_proj_w": l["out_proj_w"].astype(jnp.bfloat16),
            "out_proj_b": l["out_proj_b"].reshape(1, -1),
            "ln1_g": l["ln1_g"].reshape(1, -1), "ln1_b": l["ln1_b"].reshape(1, -1),
            "ff1_w": l["ff1_w"].astype(jnp.bfloat16),
            "ff1_b": l["ff1_b"].reshape(1, -1),
            "ff2_w": l["ff2_w"].astype(jnp.bfloat16),
            "ff2_b": l["ff2_b"].reshape(1, -1),
            "ln2_g": l["ln2_g"].reshape(1, -1), "ln2_b": l["ln2_b"].reshape(1, -1),
        })
    return prepped


def sinusoidal_pe(max_len, d_model):
    position = jnp.arange(max_len, dtype=jnp.float32)[:, None]
    div_term = jnp.exp(jnp.arange(0, d_model, 2, dtype=jnp.float32)
                       * (-math.log(10000.0) / d_model))
    pe = jnp.zeros((max_len, d_model), jnp.float32)
    pe = pe.at[:, 0::2].set(jnp.sin(position * div_term))
    pe = pe.at[:, 1::2].set(jnp.cos(position * div_term))
    return pe  # (max_len, d_model)


# ------------------------------ forward pass --------------------------------

def simple_transformer_forward(params, src, pe, *, nhead, vocab_size,
                               single_buffer_weights=True):
    """src: (B, S) int32 token ids -> (B, S, vocab) f32 logits."""
    B, S = src.shape
    # TODO(synk): embedding gather + pos-enc add kept in plain JAX (tiny glue ops).
    x = params["embedding"][src] + pe[None, :S, :]        # sqrt(d_model) pre-folded; dropout = id
    x = x.astype(jnp.bfloat16)                            # bf16 inter-layer activations
    for layer in params["layers"]:
        x = encoder_layer(x, layer, nhead,
                          single_buffer_weights=single_buffer_weights)
    _, _, D = x.shape
    logits = output_linear(x.reshape(B * S, D), params["out_w"], params["out_b"])
    return logits[:, :vocab_size].reshape(B, S, vocab_size)


def build_forward(*, nhead, vocab_size, single_buffer_weights):
    return jax.jit(functools.partial(
        simple_transformer_forward, nhead=nhead, vocab_size=vocab_size,
        single_buffer_weights=single_buffer_weights))


# --------------------------------- main --------------------------------------

if __name__ == "__main__":
    # Small shapes consistent with the module's forward.
    vocab_size = 64
    d_model = 32
    nhead = 4
    num_layers = 2
    dim_feedforward = 64
    max_len = 16
    batch, seq = 2, 8

    key = jax.random.PRNGKey(0)
    k_params, k_src = jax.random.split(key)
    raw = init_params(k_params, vocab_size, d_model, nhead, num_layers, dim_feedforward)
    params = prepare_params(raw, d_model)     # one-time: bf16 weights, padded vocab, folded scale
    pe = sinusoidal_pe(max_len, d_model)

    src = jax.random.randint(k_src, (batch, seq), 0, vocab_size, dtype=jnp.int32)

    fwd = build_forward(nhead=nhead, vocab_size=vocab_size, single_buffer_weights=True)
    try:
        logits = jax.block_until_ready(fwd(params, src, pe))
    except Exception:
        # Fallback: if this JAX build rejects single-buffered (Buffered(1)) weight
        # specs, rebuild with default double-buffering (correctness unchanged).
        fwd = build_forward(nhead=nhead, vocab_size=vocab_size,
                            single_buffer_weights=False)
        logits = jax.block_until_ready(fwd(params, src, pe))

    assert logits.shape == (batch, seq, vocab_size)
    assert logits.dtype == jnp.float32
    assert bool(jnp.all(jnp.isfinite(logits)))
    print("KERNEL_OK")
</pallas_src>

<mosaic_0001>
module attributes {stable_mosaic.version = 11 : i64} {
  func.func @_linear_kernel(%arg0: i32, %arg1: i32, %arg2: memref<16x32xbf16, #tpu.memory_space<vmem>>, %arg3: memref<32x128xbf16, #tpu.memory_space<vmem>>, %arg4: memref<1x128xf32, #tpu.memory_space<vmem>>, %arg5: memref<16x128xf32, #tpu.memory_space<vmem>>) attributes {dimension_semantics = [#tpu.dimension_semantics<parallel>, #tpu.dimension_semantics<parallel>], iteration_bounds = array<i64: 1, 1>, scalar_prefetch = 0 : i64, scratch_operands = 0 : i64, tpu.core_type = #tpu.core_type<tc>, window_params = [{transform_indices = @transform_0, window_bounds = array<i64: 16, 32>}, {transform_indices = @transform_1, window_bounds = array<i64: 32, 128>}, {transform_indices = @transform_2, window_bounds = array<i64: 1, 128>}, {transform_indices = @transform_3, window_bounds = array<i64: 16, 128>}]} {
    %c0 = arith.constant 0 : index
    %c0_0 = arith.constant 0 : index
    %0 = vector.load %arg2[%c0, %c0_0] : memref<16x32xbf16, #tpu.memory_space<vmem>>, vector<16x32xbf16>
    %c0_1 = arith.constant 0 : index
    %c0_2 = arith.constant 0 : index
    %1 = vector.load %arg3[%c0_1, %c0_2] : memref<32x128xbf16, #tpu.memory_space<vmem>>, vector<32x128xbf16>
    %cst = arith.constant dense<0.000000e+00> : vector<16x128xf32>
    %2 = tpu.matmul %0, %1, %cst {dimension_numbers = #tpu.dot_dimension_numbers<[1], [0], [0], [1], [0, 0, 1, 1], [], []>} : vector<16x32xbf16>, vector<32x128xbf16>, vector<16x128xf32> -> vector<16x128xf32>
    %c0_3 = arith.constant 0 : index
    %c0_4 = arith.constant 0 : index
    %3 = vector.load %arg4[%c0_3, %c0_4] : memref<1x128xf32, #tpu.memory_space<vmem>>, vector<1x128xf32>
    %4 = vector.broadcast %3 : vector<1x128xf32> to vector<16x128xf32>
    %5 = arith.addf %2, %4 : vector<16x128xf32>
    %c0_5 = arith.constant 0 : index
    %c0_6 = arith.constant 0 : index
    %6 = vector.load %arg5[%c0_5, %c0_6] : memref<16x128xf32, #tpu.memory_space<vmem>>, vector<16x128xf32>
    tpu.vector_store %arg5[%c0_5, %c0_6], %5 {strides = array<i32>} : memref<16x128xf32, #tpu.memory_space<vmem>>, vector<16x128xf32>,
    return
  }
  func.func @transform_0(%arg0: i32, %arg1: i32) -> (i32, i32) {
    %c0_i32 = arith.constant 0 : i32
    %c0_i32_0 = arith.constant 0 : i32
    return %arg1, %c0_i32 : i32, i32
  }
  func.func @transform_1(%arg0: i32, %arg1: i32) -> (i32, i32) {
    %c0_i32 = arith.constant 0 : i32
    %c0_i32_0 = arith.constant 0 : i32
    return %c0_i32, %arg0 : i32, i32
  }
  func.func @transform_2(%arg0: i32, %arg1: i32) -> (i32, i32) {
    %c0_i32 = arith.constant 0 : i32
    %c0_i32_0 = arith.constant 0 : i32
    return %c0_i32, %arg0 : i32, i32
  }
  func.func @transform_3(%arg0: i32, %arg1: i32) -> (i32, i32) {
    %c0_i32 = arith.constant 0 : i32
    return %arg1, %arg0 : i32, i32
  }
}

module attributes {stable_mosaic.version = 11 : i64} {
  func.func @_encoder_layer_kernel(%arg0: i32, %arg1: memref<1x8x32xbf16, #tpu.memory_space<vmem>>, %arg2: memref<32x96xbf16, #tpu.memory_space<vmem>>, %arg3: memref<1x96xf32, #tpu.memory_space<vmem>>, %arg4: memref<32x32xbf16, #tpu.memory_space<vmem>>, %arg5: memref<1x32xf32, #tpu.memory_space<vmem>>, %arg6: memref<1x32xf32, #tpu.memory_space<vmem>>, %arg7: memref<1x32xf32, #tpu.memory_space<vmem>>, %arg8: memref<32x64xbf16, #tpu.memory_space<vmem>>, %arg9: memref<1x64xf32, #tpu.memory_space<vmem>>, %arg10: memref<64x32xbf16, #tpu.memory_space<vmem>>, %arg11: memref<1x32xf32, #tpu.memory_space<vmem>>, %arg12: memref<1x32xf32, #tpu.memory_space<vmem>>, %arg13: memref<1x32xf32, #tpu.memory_space<vmem>>, %arg14: memref<1x8x32xbf16, #tpu.memory_space<vmem>>, %arg15: memref<1x8x32xf32, #tpu.memory_space<vmem>>) attributes {dimension_semantics = [#tpu.dimension_semantics<parallel>], iteration_bounds = array<i64: 2>, scalar_prefetch = 0 : i64, scratch_operands = 1 : i64, tpu.core_type = #tpu.core_type<tc>, window_params = [{transform_indices = @transform_0, window_bounds = array<i64: 1, 8, 32>}, {pipeline_mode = #tpu.pipeline_mode<synchronous>, transform_indices = @transform_1, window_bounds = array<i64: 32, 96>}, {pipeline_mode = #tpu.pipeline_mode<synchronous>, transform_indices = @transform_2, window_bounds = array<i64: 1, 96>}, {pipeline_mode = #tpu.pipeline_mode<synchronous>, transform_indices = @transform_3, window_bounds = array<i64: 32, 32>}, {pipeline_mode = #tpu.pipeline_mode<synchronous>, transform_indices = @transform_4, window_bounds = array<i64: 1, 32>}, {pipeline_mode = #tpu.pipeline_mode<synchronous>, transform_indices = @transform_5, window_bounds = array<i64: 1, 32>}, {pipeline_mode = #tpu.pipeline_mode<synchronous>, transform_indices = @transform_6, window_bounds = array<i64: 1, 32>}, {pipeline_mode = #tpu.pipeline_mode<synchronous>, transform_indices = @transform_7, window_bounds = array<i64: 32, 64>}, {pipeline_mode = #tpu.pipeline_mode<synchronous>, transform_indices = @transform_8, window_bounds = array<i64: 1, 64>}, {pipeline_mode = #tpu.pipeline_mode<synchronous>, transform_indices = @transform_9, window_bounds = array<i64: 64, 32>}, {pipeline_mode = #tpu.pipeline_mode<synchronous>, transform_indices = @transform_10, window_bounds = array<i64: 1, 32>}, {pipeline_mode = #tpu.pipeline_mode<synchronous>, transform_indices = @transform_11, window_bounds = array<i64: 1, 32>}, {pipeline_mode = #tpu.pipeline_mode<synchronous>, transform_indices = @transform_12, window_bounds = array<i64: 1, 32>}, {transform_indices = @transform_13, window_bounds = array<i64: 1, 8, 32>}]} {
    %c0 = arith.constant 0 : index
    %c0_0 = arith.constant 0 : index
    %c0_1 = arith.constant 0 : index
    %0 = vector.load %arg1[%c0, %c0_0, %c0_1] : memref<1x8x32xbf16, #tpu.memory_space<vmem>>, vector<1x8x32xbf16>
    %1 = arith.extf %0 : vector<1x8x32xbf16> to vector<1x8x32xf32>
    %2 = vector.shape_cast %1 : vector<1x8x32xf32> to vector<8x32xf32>
    %3 = arith.truncf %2 : vector<8x32xf32> to vector<8x32xbf16>
    %c0_2 = arith.constant 0 : index
    %c0_3 = arith.constant 0 : index
    %4 = vector.load %arg2[%c0_2, %c0_3] : memref<32x96xbf16, #tpu.memory_space<vmem>>, vector<32x96xbf16>
    %cst = arith.constant dense<0.000000e+00> : vector<8x96xf32>
    %5 = tpu.matmul %3, %4, %cst {dimension_numbers = #tpu.dot_dimension_numbers<[1], [0], [0], [1], [0, 0, 1, 1], [], []>} : vector<8x32xbf16>, vector<32x96xbf16>, vector<8x96xf32> -> vector<8x96xf32>
    %c0_4 = arith.constant 0 : index
    %c0_5 = arith.constant 0 : index
    %6 = vector.load %arg3[%c0_4, %c0_5] : memref<1x96xf32, #tpu.memory_space<vmem>>, vector<1x96xf32>
    %7 = vector.broadcast %6 : vector<1x96xf32> to vector<8x96xf32>
    %8 = arith.addf %5, %7 : vector<8x96xf32>
    %9 = vector.shape_cast %8 : vector<8x96xf32> to vector<1x8x96xf32>
    %10 = vector.extract_strided_slice %9 {offsets = [0, 0, 0], sizes = [1, 8, 8], strides = [1, 1, 1]} : vector<1x8x96xf32> to vector<1x8x8xf32>
    %11 = arith.truncf %10 : vector<1x8x8xf32> to vector<1x8x8xbf16>
    %12 = vector.extract_strided_slice %9 {offsets = [0, 0, 32], sizes = [1, 8, 8], strides = [1, 1, 1]} : vector<1x8x96xf32> to vector<1x8x8xf32>
    %13 = arith.truncf %12 : vector<1x8x8xf32> to vector<1x8x8xbf16>
    %14 = vector.extract_strided_slice %9 {offsets = [0, 0, 64], sizes = [1, 8, 8], strides = [1, 1, 1]} : vector<1x8x96xf32> to vector<1x8x8xf32>
    %15 = arith.truncf %14 : vector<1x8x8xf32> to vector<1x8x8xbf16>
    "tpu.trace_start"() <{level = 10 : i32, message = "bqd,bkd->bqk"}> : () -> ()
    %cst_6 = arith.constant dense<0.000000e+00> : vector<1x8x8xf32>
    %16 = tpu.matmul %11, %13, %cst_6 {dimension_numbers = #tpu.dot_dimension_numbers<[2], [2], [1], [1], [0, 0, 0, 1, 1, 1], [0], [0]>} : vector<1x8x8xbf16>, vector<1x8x8xbf16>, vector<1x8x8xf32> -> vector<1x8x8xf32>
    "tpu.trace_stop"() : () -> ()
    %cst_7 = arith.constant 0.353553385 : f32
    %17 = vector.broadcast %cst_7 : f32 to vector<1x8x8xf32>
    %18 = arith.mulf %16, %17 : vector<1x8x8xf32>
    %cst_8 = arith.constant dense<0xFF800000> : vector<1x8xf32>
    %19 = vector.multi_reduction <maximumf>, %18, %cst_8 [2] : vector<1x8x8xf32> to vector<1x8xf32>
    %20 = vector.shape_cast %19 : vector<1x8xf32> to vector<1x8x1xf32>
    %21 = vector.broadcast %20 : vector<1x8x1xf32> to vector<1x8x8xf32>
    %22 = arith.subf %18, %21 : vector<1x8x8xf32>
    %23 = math.exp %22 : vector<1x8x8xf32>
    %cst_9 = arith.constant dense<0.000000e+00> : vector<1x8xf32>
    %24 = vector.multi_reduction <add>, %23, %cst_9 [2] : vector<1x8x8xf32> to vector<1x8xf32>
    %25 = vector.shape_cast %24 : vector<1x8xf32> to vector<1x8x1xf32>
    %26 = tpu.reciprocal %25 {approx = true} : vector<1x8x1xf32> -> vector<1x8x1xf32>
    %27 = vector.broadcast %26 : vector<1x8x1xf32> to vector<1x8x8xf32>
    %28 = arith.mulf %23, %27 : vector<1x8x8xf32>
    %29 = arith.truncf %28 : vector<1x8x8xf32> to vector<1x8x8xbf16>
    "tpu.trace_start"() <{level = 10 : i32, message = "bqk,bkd->bqd"}> : () -> ()
    %cst_10 = arith.constant dense<0.000000e+00> : vector<1x8x8xf32>
    %30 = tpu.matmul %29, %15, %cst_10 {dimension_numbers = #tpu.dot_dimension_numbers<[2], [1], [1], [2], [0, 0, 0, 1, 1, 2], [0], [0]>} : vector<1x8x8xbf16>, vector<1x8x8xbf16>, vector<1x8x8xf32> -> vector<1x8x8xf32>
    "tpu.trace_stop"() : () -> ()
    %c0_11 = arith.constant 0 : index
    %c0_12 = arith.constant 0 : index
    %c0_13 = arith.constant 0 : index
    %31 = vector.load %arg15[%c0_11, %c0_12, %c0_13] : memref<1x8x32xf32, #tpu.memory_space<vmem>>, vector<1x8x8xf32>
    tpu.vector_store %arg15[%c0_11, %c0_12, %c0_13], %30 {strides = array<i32>} : memref<1x8x32xf32, #tpu.memory_space<vmem>>, vector<1x8x8xf32>,
    %32 = vector.extract_strided_slice %9 {offsets = [0, 0, 8], sizes = [1, 8, 8], strides = [1, 1, 1]} : vector<1x8x96xf32> to vector<1x8x8xf32>
    %33 = arith.truncf %32 : vector<1x8x8xf32> to vector<1x8x8xbf16>
    %34 = vector.extract_strided_slice %9 {offsets = [0, 0, 40], sizes = [1, 8, 8], strides = [1, 1, 1]} : vector<1x8x96xf32> to vector<1x8x8xf32>
    %35 = arith.truncf %34 : vector<1x8x8xf32> to vector<1x8x8xbf16>
    %36 = vector.extract_strided_slice %9 {offsets = [0, 0, 72], sizes = [1, 8, 8], strides = [1, 1, 1]} : vector<1x8x96xf32> to vector<1x8x8xf32>
    %37 = arith.truncf %36 : vector<1x8x8xf32> to vector<1x8x8xbf16>
    "tpu.trace_start"() <{level = 10 : i32, message = "bqd,bkd->bqk"}> : () -> ()
    %cst_14 = arith.constant dense<0.000000e+00> : vector<1x8x8xf32>
    %38 = tpu.matmul %33, %35, %cst_14 {dimension_numbers = #tpu.dot_dimension_numbers<[2], [2], [1], [1], [0, 0, 0, 1, 1, 1], [0], [0]>} : vector<1x8x8xbf16>, vector<1x8x8xbf16>, vector<1x8x8xf32> -> vector<1x8x8xf32>
    "tpu.trace_stop"() : () -> ()
    %cst_15 = arith.constant 0.353553385 : f32
    %39 = vector.broadcast %cst_15 : f32 to vector<1x8x8xf32>
    %40 = arith.mulf %38, %39 : vector<1x8x8xf32>
    %cst_16 = arith.constant dense<0xFF800000> : vector<1x8xf32>
    %41 = vector.multi_reduction <maximumf>, %40, %cst_16 [2] : vector<1x8x8xf32> to vector<1x8xf32>
    %42 = vector.shape_cast %41 : vector<1x8xf32> to vector<1x8x1xf32>
    %43 = vector.broadcast %42 : vector<1x8x1xf32> to vector<1x8x8xf32>
    %44 = arith.subf %40, %43 : vector<1x8x8xf32>
    %45 = math.exp %44 : vector<1x8x8xf32>
    %cst_17 = arith.constant dense<0.000000e+00> : vector<1x8xf32>
    %46 = vector.multi_reduction <add>, %45, %cst_17 [2] : vector<1x8x8xf32> to vector<1x8xf32>
    %47 = vector.shape_cast %46 : vector<1x8xf32> to vector<1x8x1xf32>
    %48 = tpu.reciprocal %47 {approx = true} : vector<1x8x1xf32> -> vector<1x8x1xf32>
    %49 = vector.broadcast %48 : vector<1x8x1xf32> to vector<1x8x8xf32>
    %50 = arith.mulf %45, %49 : vector<1x8x8xf32>
    %51 = arith.truncf %50 : vector<1x8x8xf32> to vector<1x8x8xbf16>
    "tpu.trace_start"() <{level = 10 : i32, message = "bqk,bkd->bqd"}> : () -> ()
    %cst_18 = arith.constant dense<0.000000e+00> : vector<1x8x8xf32>
    %52 = tpu.matmul %51, %37, %cst_18 {dimension_numbers = #tpu.dot_dimension_numbers<[2], [1], [1], [2], [0, 0, 0, 1, 1, 2], [0], [0]>} : vector<1x8x8xbf16>, vector<1x8x8xbf16>, vector<1x8x8xf32> -> vector<1x8x8xf32>
    "tpu.trace_stop"() : () -> ()
    %c0_19 = arith.constant 0 : index
    %c0_20 = arith.constant 0 : index
    %c8 = arith.constant 8 : index
    %53 = vector.load %arg15[%c0_19, %c0_20, %c8] : memref<1x8x32xf32, #tpu.memory_space<vmem>>, vector<1x8x8xf32>
    tpu.vector_store %arg15[%c0_19, %c0_20, %c8], %52 {strides = array<i32>} : memref<1x8x32xf32, #tpu.memory_space<vmem>>, vector<1x8x8xf32>,
    %54 = vector.extract_strided_slice %9 {offsets = [0, 0, 16], sizes = [1, 8, 8], strides = [1, 1, 1]} : vector<1x8x96xf32> to vector<1x8x8xf32>
    %55 = arith.truncf %54 : vector<1x8x8xf32> to vector<1x8x8xbf16>
    %56 = vector.extract_strided_slice %9 {offsets = [0, 0, 48], sizes = [1, 8, 8], strides = [1, 1, 1]} : vector<1x8x96xf32> to vector<1x8x8xf32>
    %57 = arith.truncf %56 : vector<1x8x8xf32> to vector<1x8x8xbf16>
    %58 = vector.extract_strided_slice %9 {offsets = [0, 0, 80], sizes = [1, 8, 8], strides = [1, 1, 1]} : vector<1x8x96xf32> to vector<1x8x8xf32>
    %59 = arith.truncf %58 : vector<1x8x8xf32> to vector<1x8x8xbf16>
    "tpu.trace_start"() <{level = 10 : i32, message = "bqd,bkd->bqk"}> : () -> ()
    %cst_21 = arith.constant dense<0.000000e+00> : vector<1x8x8xf32>
    %60 = tpu.matmul %55, %57, %cst_21 {dimension_numbers = #tpu.dot_dimension_numbers<[2], [2], [1], [1], [0, 0, 0, 1, 1, 1], [0], [0]>} : vector<1x8x8xbf16>, vector<1x8x8xbf16>, vector<1x8x8xf32> -> vector<1x8x8xf32>
    "tpu.trace_stop"() : () -> ()
    %cst_22 = arith.constant 0.353553385 : f32
    %61 = vector.broadcast %cst_22 : f32 to vector<1x8x8xf32>
    %62 = arith.mulf %60, %61 : vector<1x8x8xf32>
    %cst_23 = arith.constant dense<0xFF800000> : vector<1x8xf32>
    %63 = vector.multi_reduction <maximumf>, %62, %cst_23 [2] : vector<1x8x8xf32> to vector<1x8xf32>
    %64 = vector.shape_cast %63 : vector<1x8xf32> to vector<1x8x1xf32>
    %65 = vector.broadcast %64 : vector<1x8x1xf32> to vector<1x8x8xf32>
    %66 = arith.subf %62, %65 : vector<1x8x8xf32>
    %67 = math.exp %66 : vector<1x8x8xf32>
    %cst_24 = arith.constant dense<0.000000e+00> : vector<1x8xf32>
    %68 = vector.multi_reduction <add>, %67, %cst_24 [2] : vector<1x8x8xf32> to vector<1x8xf32>
    %69 = vector.shape_cast %68 : vector<1x8xf32> to vector<1x8x1xf32>
    %70 = tpu.reciprocal %69 {approx = true} : vector<1x8x1xf32> -> vector<1x8x1xf32>
    %71 = vector.broadcast %70 : vector<1x8x1xf32> to vector<1x8x8xf32>
    %72 = arith.mulf %67, %71 : vector<1x8x8xf32>
    %73 = arith.truncf %72 : vector<1x8x8xf32> to vector<1x8x8xbf16>
    "tpu.trace_start"() <{level = 10 : i32, message = "bqk,bkd->bqd"}> : () -> ()
    %cst_25 = arith.constant dense<0.000000e+00> : vector<1x8x8xf32>
    %74 = tpu.matmul %73, %59, %cst_25 {dimension_numbers = #tpu.dot_dimension_numbers<[2], [1], [1], [2], [0, 0, 0, 1, 1, 2], [0], [0]>} : vector<1x8x8xbf16>, vector<1x8x8xbf16>, vector<1x8x8xf32> -> vector<1x8x8xf32>
    "tpu.trace_stop"() : () -> ()
    %c0_26 = arith.constant 0 : index
    %c0_27 = arith.constant 0 : index
    %c16 = arith.constant 16 : index
    %75 = vector.load %arg15[%c0_26, %c0_27, %c16] : memref<1x8x32xf32, #tpu.memory_space<vmem>>, vector<1x8x8xf32>
    tpu.vector_store %arg15[%c0_26, %c0_27, %c16], %74 {strides = array<i32>} : memref<1x8x32xf32, #tpu.memory_space<vmem>>, vector<1x8x8xf32>,
    %76 = vector.extract_strided_slice %9 {offsets = [0, 0, 24], sizes = [1, 8, 8], strides = [1, 1, 1]} : vector<1x8x96xf32> to vector<1x8x8xf32>
    %77 = arith.truncf %76 : vector<1x8x8xf32> to vector<1x8x8xbf16>
    %78 = vector.extract_strided_slice %9 {offsets = [0, 0, 56], sizes = [1, 8, 8], strides = [1, 1, 1]} : vector<1x8x96xf32> to vector<1x8x8xf32>
    %79 = arith.truncf %78 : vector<1x8x8xf32> to vector<1x8x8xbf16>
    %80 = vector.extract_strided_slice %9 {offsets = [0, 0, 88], sizes = [1, 8, 8], strides = [1, 1, 1]} : vector<1x8x96xf32> to vector<1x8x8xf32>
    %81 = arith.truncf %80 : vector<1x8x8xf32> to vector<1x8x8xbf16>
    "tpu.trace_start"() <{level = 10 : i32, message = "bqd,bkd->bqk"}> : () -> ()
    %cst_28 = arith.constant dense<0.000000e+00> : vector<1x8x8xf32>
    %82 = tpu.matmul %77, %79, %cst_28 {dimension_numbers = #tpu.dot_dimension_numbers<[2], [2], [1], [1], [0, 0, 0, 1, 1, 1], [0], [0]>} : vector<1x8x8xbf16>, vector<1x8x8xbf16>, vector<1x8x8xf32> -> vector<1x8x8xf32>
    "tpu.trace_stop"() : () -> ()
    %cst_29 = arith.constant 0.353553385 : f32
    %83 = vector.broadcast %cst_29 : f32 to vector<1x8x8xf32>
    %84 = arith.mulf %82, %83 : vector<1x8x8xf32>
    %cst_30 = arith.constant dense<0xFF800000> : vector<1x8xf32>
    %85 = vector.multi_reduction <maximumf>, %84, %cst_30 [2] : vector<1x8x8xf32> to vector<1x8xf32>
    %86 = vector.shape_cast %85 : vector<1x8xf32> to vector<1x8x1xf32>
    %87 = vector.broadcast %86 : vector<1x8x1xf32> to vector<1x8x8xf32>
    %88 = arith.subf %84, %87 : vector<1x8x8xf32>
    %89 = math.exp %88 : vector<1x8x8xf32>
    %cst_31 = arith.constant dense<0.000000e+00> : vector<1x8xf32>
    %90 = vector.multi_reduction <add>, %89, %cst_31 [2] : vector<1x8x8xf32> to vector<1x8xf32>
    %91 = vector.shape_cast %90 : vector<1x8xf32> to vector<1x8x1xf32>
    %92 = tpu.reciprocal %91 {approx = true} : vector<1x8x1xf32> -> vector<1x8x1xf32>
    %93 = vector.broadcast %92 : vector<1x8x1xf32> to vector<1x8x8xf32>
    %94 = arith.mulf %89, %93 : vector<1x8x8xf32>
    %95 = arith.truncf %94 : vector<1x8x8xf32> to vector<1x8x8xbf16>
    "tpu.trace_start"() <{level = 10 : i32, message = "bqk,bkd->bqd"}> : () -> ()
    %cst_32 = arith.constant dense<0.000000e+00> : vector<1x8x8xf32>
    %96 = tpu.matmul %95, %81, %cst_32 {dimension_numbers = #tpu.dot_dimension_numbers<[2], [1], [1], [2], [0, 0, 0, 1, 1, 2], [0], [0]>} : vector<1x8x8xbf16>, vector<1x8x8xbf16>, vector<1x8x8xf32> -> vector<1x8x8xf32>
    "tpu.trace_stop"() : () -> ()
    %c0_33 = arith.constant 0 : index
    %c0_34 = arith.constant 0 : index
    %c24 = arith.constant 24 : index
    %97 = vector.load %arg15[%c0_33, %c0_34, %c24] : memref<1x8x32xf32, #tpu.memory_space<vmem>>, vector<1x8x8xf32>
    tpu.vector_store %arg15[%c0_33, %c0_34, %c24], %96 {strides = array<i32>} : memref<1x8x32xf32, #tpu.memory_space<vmem>>, vector<1x8x8xf32>,
    %c0_35 = arith.constant 0 : index
    %c0_36 = arith.constant 0 : index
    %c0_37 = arith.constant 0 : index
    %98 = vector.load %arg15[%c0_35, %c0_36, %c0_37] : memref<1x8x32xf32, #tpu.memory_space<vmem>>, vector<1x8x32xf32>
    %99 = vector.shape_cast %98 : vector<1x8x32xf32> to vector<8x32xf32>
    %100 = arith.truncf %99 : vector<8x32xf32> to vector<8x32xbf16>
    %c0_38 = arith.constant 0 : index
    %c0_39 = arith.constant 0 : index
    %101 = vector.load %arg4[%c0_38, %c0_39] : memref<32x32xbf16, #tpu.memory_space<vmem>>, vector<32x32xbf16>
    %cst_40 = arith.constant dense<0.000000e+00> : vector<8x32xf32>
    %102 = tpu.matmul %100, %101, %cst_40 {dimension_numbers = #tpu.dot_dimension_numbers<[1], [0], [0], [1], [0, 0, 1, 1], [], []>} : vector<8x32xbf16>, vector<32x32xbf16>, vector<8x32xf32> -> vector<8x32xf32>
    %c0_41 = arith.constant 0 : index
    %c0_42 = arith.constant 0 : index
    %103 = vector.load %arg5[%c0_41, %c0_42] : memref<1x32xf32, #tpu.memory_space<vmem>>, vector<1x32xf32>
    %104 = vector.broadcast %103 : vector<1x32xf32> to vector<8x32xf32>
    %105 = arith.addf %102, %104 : vector<8x32xf32>
    %106 = arith.addf %2, %105 : vector<8x32xf32>
    %cst_43 = arith.constant dense<0.000000e+00> : vector<8xf32>
    %107 = vector.multi_reduction <add>, %106, %cst_43 [1] : vector<8x32xf32> to vector<8xf32>
    %108 = vector.shape_cast %107 : vector<8xf32> to vector<8x1xf32>
    %cst_44 = arith.constant 3.200000e+01 : f32
    %109 = vector.broadcast %cst_44 : f32 to vector<8x1xf32>
    %110 = arith.divf %108, %109 : vector<8x1xf32>
    %111 = vector.broadcast %110 : vector<8x1xf32> to vector<8x32xf32>
    %112 = arith.subf %106, %111 : vector<8x32xf32>
    %113 = arith.mulf %112, %112 : vector<8x32xf32>
    %cst_45 = arith.constant dense<0.000000e+00> : vector<8xf32>
    %114 = vector.multi_reduction <add>, %113, %cst_45 [1] : vector<8x32xf32> to vector<8xf32>
    %115 = vector.shape_cast %114 : vector<8xf32> to vector<8x1xf32>
    %cst_46 = arith.constant 3.200000e+01 : f32
    %116 = vector.broadcast %cst_46 : f32 to vector<8x1xf32>
    %117 = arith.divf %115, %116 : vector<8x1xf32>
    %118 = vector.broadcast %110 : vector<8x1xf32> to vector<8x32xf32>
    %119 = arith.subf %106, %118 : vector<8x32xf32>
    %cst_47 = arith.constant 9.99999974E-6 : f32
    %120 = vector.broadcast %cst_47 : f32 to vector<8x1xf32>
    %121 = arith.addf %117, %120 : vector<8x1xf32>
    %122 = math.rsqrt %121 : vector<8x1xf32>
    %123 = vector.broadcast %122 : vector<8x1xf32> to vector<8x32xf32>
    %124 = arith.mulf %119, %123 : vector<8x32xf32>
    %c0_48 = arith.constant 0 : index
    %c0_49 = arith.constant 0 : index
    %125 = vector.load %arg6[%c0_48, %c0_49] : memref<1x32xf32, #tpu.memory_space<vmem>>, vector<1x32xf32>
    %126 = vector.broadcast %125 : vector<1x32xf32> to vector<8x32xf32>
    %127 = arith.mulf %124, %126 : vector<8x32xf32>
    %c0_50 = arith.constant 0 : index
    %c0_51 = arith.constant 0 : index
    %128 = vector.load %arg7[%c0_50, %c0_51] : memref<1x32xf32, #tpu.memory_space<vmem>>, vector<1x32xf32>
    %129 = vector.broadcast %128 : vector<1x32xf32> to vector<8x32xf32>
    %130 = arith.addf %127, %129 : vector<8x32xf32>
    %131 = arith.truncf %130 : vector<8x32xf32> to vector<8x32xbf16>
    %c0_52 = arith.constant 0 : index
    %c0_53 = arith.constant 0 : index
    %132 = vector.load %arg8[%c0_52, %c0_53] : memref<32x64xbf16, #tpu.memory_space<vmem>>, vector<32x64xbf16>
    %cst_54 = arith.constant dense<0.000000e+00> : vector<8x64xf32>
    %133 = tpu.matmul %131, %132, %cst_54 {dimension_numbers = #tpu.dot_dimension_numbers<[1], [0], [0], [1], [0, 0, 1, 1], [], []>} : vector<8x32xbf16>, vector<32x64xbf16>, vector<8x64xf32> -> vector<8x64xf32>
    %c0_55 = arith.constant 0 : index
    %c0_56 = arith.constant 0 : index
    %134 = vector.load %arg9[%c0_55, %c0_56] : memref<1x64xf32, #tpu.memory_space<vmem>>, vector<1x64xf32>
    %135 = vector.broadcast %134 : vector<1x64xf32> to vector<8x64xf32>
    %136 = arith.addf %133, %135 : vector<8x64xf32>
    %cst_57 = arith.constant 0.000000e+00 : f32
    %137 = vector.broadcast %cst_57 : f32 to vector<8x64xf32>
    %138 = arith.maximumf %136, %137 : vector<8x64xf32>
    %139 = arith.truncf %138 : vector<8x64xf32> to vector<8x64xbf16>
    %c0_58 = arith.constant 0 : index
    %c0_59 = arith.constant 0 : index
    %140 = vector.load %arg10[%c0_58, %c0_59] : memref<64x32xbf16, #tpu.memory_space<vmem>>, vector<64x32xbf16>
    %cst_60 = arith.constant dense<0.000000e+00> : vector<8x32xf32>
    %141 = tpu.matmul %139, %140, %cst_60 {dimension_numbers = #tpu.dot_dimension_numbers<[1], [0], [0], [1], [0, 0, 1, 1], [], []>} : vector<8x64xbf16>, vector<64x32xbf16>, vector<8x32xf32> -> vector<8x32xf32>
    %c0_61 = arith.constant 0 : index
    %c0_62 = arith.constant 0 : index
    %142 = vector.load %arg11[%c0_61, %c0_62] : memref<1x32xf32, #tpu.memory_space<vmem>>, vector<1x32xf32>
    %143 = vector.broadcast %142 : vector<1x32xf32> to vector<8x32xf32>
    %144 = arith.addf %141, %143 : vector<8x32xf32>
    %145 = arith.addf %130, %144 : vector<8x32xf32>
    %cst_63 = arith.constant dense<0.000000e+00> : vector<8xf32>
    %146 = vector.multi_reduction <add>, %145, %cst_63 [1] : vector<8x32xf32> to vector<8xf32>
    %147 = vector.shape_cast %146 : vector<8xf32> to vector<8x1xf32>
    %cst_64 = arith.constant 3.200000e+01 : f32
    %148 = vector.broadcast %cst_64 : f32 to vector<8x1xf32>
    %149 = arith.divf %147, %148 : vector<8x1xf32>
    %150 = vector.broadcast %149 : vector<8x1xf32> to vector<8x32xf32>
    %151 = arith.subf %145, %150 : vector<8x32xf32>
    %152 = arith.mulf %151, %151 : vector<8x32xf32>
    %cst_65 = arith.constant dense<0.000000e+00> : vector<8xf32>
    %153 = vector.multi_reduction <add>, %152, %cst_65 [1] : vector<8x32xf32> to vector<8xf32>
    %154 = vector.shape_cast %153 : vector<8xf32> to vector<8x1xf32>
    %cst_66 = arith.constant 3.200000e+01 : f32
    %155 = vector.broadcast %cst_66 : f32 to vector<8x1xf32>
    %156 = arith.divf %154, %155 : vector<8x1xf32>
    %157 = vector.broadcast %149 : vector<8x1xf32> to vector<8x32xf32>
    %158 = arith.subf %145, %157 : vector<8x32xf32>
    %cst_67 = arith.constant 9.99999974E-6 : f32
    %159 = vector.broadcast %cst_67 : f32 to vector<8x1xf32>
    %160 = arith.addf %156, %159 : vector<8x1xf32>
    %161 = math.rsqrt %160 : vector<8x1xf32>
    %162 = vector.broadcast %161 : vector<8x1xf32> to vector<8x32xf32>
    %163 = arith.mulf %158, %162 : vector<8x32xf32>
    %c0_68 = arith.constant 0 : index
    %c0_69 = arith.constant 0 : index
    %164 = vector.load %arg12[%c0_68, %c0_69] : memref<1x32xf32, #tpu.memory_space<vmem>>, vector<1x32xf32>
    %165 = vector.broadcast %164 : vector<1x32xf32> to vector<8x32xf32>
    %166 = arith.mulf %163, %165 : vector<8x32xf32>
    %c0_70 = arith.constant 0 : index
    %c0_71 = arith.constant 0 : index
    %167 = vector.load %arg13[%c0_70, %c0_71] : memref<1x32xf32, #tpu.memory_space<vmem>>, vector<1x32xf32>
    %168 = vector.broadcast %167 : vector<1x32xf32> to vector<8x32xf32>
    %169 = arith.addf %166, %168 : vector<8x32xf32>
    %170 = vector.shape_cast %169 : vector<8x32xf32> to vector<1x8x32xf32>
    %171 = arith.truncf %170 : vector<1x8x32xf32> to vector<1x8x32xbf16>
    %c0_72 = arith.constant 0 : index
    %c0_73 = arith.constant 0 : index
    %c0_74 = arith.constant 0 : index
    %172 = vector.load %arg14[%c0_72, %c0_73, %c0_74] : memref<1x8x32xbf16, #tpu.memory_space<vmem>>, vector<1x8x32xbf16>
    tpu.vector_store %arg14[%c0_72, %c0_73, %c0_74], %171 {strides = array<i32>} : memref<1x8x32xbf16, #tpu.memory_space<vmem>>, vector<1x8x32xbf16>,
    return
  }
  func.func @transform_0(%arg0: i32) -> (i32, i32, i32) {
    %c0_i32 = arith.constant 0 : i32
    %c0_i32_0 = arith.constant 0 : i32
    %c0_i32_1 = arith.constant 0 : i32
    return %arg0, %c0_i32, %c0_i32_0 : i32, i32, i32
  }
  func.func @transform_1(%arg0: i32) -> (i32, i32) {
    %c0_i32 = arith.constant 0 : i32
    %c0_i32_0 = arith.constant 0 : i32
    %c0_i32_1 = arith.constant 0 : i32
    return %c0_i32, %c0_i32_0 : i32, i32
  }
  func.func @transform_2(%arg0: i32) -> (i32, i32) {
    %c0_i32 = arith.constant 0 : i32
    %c0_i32_0 = arith.constant 0 : i32
    %c0_i32_1 = arith.constant 0 : i32
    return %c0_i32, %c0_i32_0 : i32, i32
  }
  func.func @transform_3(%arg0: i32) -> (i32, i32) {
    %c0_i32 = arith.constant 0 : i32
    %c0_i32_0 = arith.constant 0 : i32
    %c0_i32_1 = arith.constant 0 : i32
    return %c0_i32, %c0_i32_0 : i32, i32
  }
  func.func @transform_4(%arg0: i32) -> (i32, i32) {
    %c0_i32 = arith.constant 0 : i32
    %c0_i32_0 = arith.constant 0 : i32
    %c0_i32_1 = arith.constant 0 : i32
    return %c0_i32, %c0_i32_0 : i32, i32
  }
  func.func @transform_5(%arg0: i32) -> (i32, i32) {
    %c0_i32 = arith.constant 0 : i32
    %c0_i32_0 = arith.constant 0 : i32
    %c0_i32_1 = arith.constant 0 : i32
    return %c0_i32, %c0_i32_0 : i32, i32
  }
  func.func @transform_6(%arg0: i32) -> (i32, i32) {
    %c0_i32 = arith.constant 0 : i32
    %c0_i32_0 = arith.constant 0 : i32
    %c0_i32_1 = arith.constant 0 : i32
    return %c0_i32, %c0_i32_0 : i32, i32
  }
  func.func @transform_7(%arg0: i32) -> (i32, i32) {
    %c0_i32 = arith.constant 0 : i32
    %c0_i32_0 = arith.constant 0 : i32
    %c0_i32_1 = arith.constant 0 : i32
    return %c0_i32, %c0_i32_0 : i32, i32
  }
  func.func @transform_8(%arg0: i32) -> (i32, i32) {
    %c0_i32 = arith.constant 0 : i32
    %c0_i32_0 = arith.constant 0 : i32
    %c0_i32_1 = arith.constant 0 : i32
    return %c0_i32, %c0_i32_0 : i32, i32
  }
  func.func @transform_9(%arg0: i32) -> (i32, i32) {
    %c0_i32 = arith.constant 0 : i32
    %c0_i32_0 = arith.constant 0 : i32
    %c0_i32_1 = arith.constant 0 : i32
    return %c0_i32, %c0_i32_0 : i32, i32
  }
  func.func @transform_10(%arg0: i32) -> (i32, i32) {
    %c0_i32 = arith.constant 0 : i32
    %c0_i32_0 = arith.constant 0 : i32
    %c0_i32_1 = arith.constant 0 : i32
    return %c0_i32, %c0_i32_0 : i32, i32
  }
  func.func @transform_11(%arg0: i32) -> (i32, i32) {
    %c0_i32 = arith.constant 0 : i32
    %c0_i32_0 = arith.constant 0 : i32
    %c0_i32_1 = arith.constant 0 : i32
    return %c0_i32, %c0_i32_0 : i32, i32
  }
  func.func @transform_12(%arg0: i32) -> (i32, i32) {
    %c0_i32 = arith.constant 0 : i32
    %c0_i32_0 = arith.constant 0 : i32
    %c0_i32_1 = arith.constant 0 : i32
    return %c0_i32, %c0_i32_0 : i32, i32
  }
  func.func @transform_13(%arg0: i32) -> (i32, i32, i32) {
    %c0_i32 = arith.constant 0 : i32
    %c0_i32_0 = arith.constant 0 : i32
    %c0_i32_1 = arith.constant 0 : i32
    return %arg0, %c0_i32, %c0_i32_0 : i32, i32, i32
  }
}

module attributes {stable_mosaic.version = 11 : i64} {
  func.func @_linear_kernel(%arg0: i32, %arg1: i32, %arg2: memref<16x32xbf16, #tpu.memory_space<vmem>>, %arg3: memref<32x128xbf16, #tpu.memory_space<vmem>>, %arg4: memref<1x128xf32, #tpu.memory_space<vmem>>, %arg5: memref<16x128xf32, #tpu.memory_space<vmem>>) attributes {dimension_semantics = [#tpu.dimension_semantics<parallel>, #tpu.dimension_semantics<parallel>], iteration_bounds = array<i64: 1, 1>, scalar_prefetch = 0 : i64, scratch_operands = 0 : i64, tpu.core_type = #tpu.core_type<tc>, window_params = [{transform_indices = @transform_0, window_bounds = array<i64: 16, 32>}, {transform_indices = @transform_1, window_bounds = array<i64: 32, 128>}, {transform_indices = @transform_2, window_bounds = array<i64: 1, 128>}, {transform_indices = @transform_3, window_bounds = array<i64: 16, 128>}]} {
    %c0 = arith.constant 0 : index
    %c0_0 = arith.constant 0 : index
    %0 = vector.load %arg2[%c0, %c0_0] : memref<16x32xbf16, #tpu.memory_space<vmem>>, vector<16x32xbf16>
    %c0_1 = arith.constant 0 : index
    %c0_2 = arith.constant 0 : index
    %1 = vector.load %arg3[%c0_1, %c0_2] : memref<32x128xbf16, #tpu.memory_space<vmem>>, vector<32x128xbf16>
    %cst = arith.constant dense<0.000000e+00> : vector<16x128xf32>
    %2 = tpu.matmul %0, %1, %cst {dimension_numbers = #tpu.dot_dimension_numbers<[1], [0], [0], [1], [0, 0, 1, 1], [], []>} : vector<16x32xbf16>, vector<32x128xbf16>, vector<16x128xf32> -> vector<16x128xf32>
    %c0_3 = arith.constant 0 : index
    %c0_4 = arith.constant 0 : index
    %3 = vector.load %arg4[%c0_3, %c0_4] : memref<1x128xf32, #tpu.memory_space<vmem>>, vector<1x128xf32>
    %4 = vector.broadcast %3 : vector<1x128xf32> to vector<16x128xf32>
    %5 = arith.addf %2, %4 : vector<16x128xf32>
    %c0_5 = arith.constant 0 : index
    %c0_6 = arith.constant 0 : index
    %6 = vector.load %arg5[%c0_5, %c0_6] : memref<16x128xf32, #tpu.memory_space<vmem>>, vector<16x128xf32>
    tpu.vector_store %arg5[%c0_5, %c0_6], %5 {strides = array<i32>} : memref<16x128xf32, #tpu.memory_space<vmem>>, vector<16x128xf32>,
    return
  }
  func.func @transform_0(%arg0: i32, %arg1: i32) -> (i32, i32) {
    %c0_i32 = arith.constant 0 : i32
    %c0_i32_0 = arith.constant 0 : i32
    return %arg1, %c0_i32 : i32, i32
  }
  func.func @transform_1(%arg0: i32, %arg1: i32) -> (i32, i32) {
    %c0_i32 = arith.constant 0 : i32
    %c0_i32_0 = arith.constant 0 : i32
    return %c0_i32, %arg0 : i32, i32
  }
  func.func @transform_2(%arg0: i32, %arg1: i32) -> (i32, i32) {
    %c0_i32 = arith.constant 0 : i32
    %c0_i32_0 = arith.constant 0 : i32
    return %c0_i32, %arg0 : i32, i32
  }
  func.func @transform_3(%arg0: i32, %arg1: i32) -> (i32, i32) {
    %c0_i32 = arith.constant 0 : i32
    return %arg1, %arg0 : i32, i32
  }
}

module attributes {stable_mosaic.version = 11 : i64} {
  func.func @_encoder_layer_kernel(%arg0: i32, %arg1: memref<1x8x32xbf16, #tpu.memory_space<vmem>>, %arg2: memref<32x96xbf16, #tpu.memory_space<vmem>>, %arg3: memref<1x96xf32, #tpu.memory_space<vmem>>, %arg4: memref<32x32xbf16, #tpu.memory_space<vmem>>, %arg5: memref<1x32xf32, #tpu.memory_space<vmem>>, %arg6: memref<1x32xf32, #tpu.memory_space<vmem>>, %arg7: memref<1x32xf32, #tpu.memory_space<vmem>>, %arg8: memref<32x64xbf16, #tpu.memory_space<vmem>>, %arg9: memref<1x64xf32, #tpu.memory_space<vmem>>, %arg10: memref<64x32xbf16, #tpu.memory_space<vmem>>, %arg11: memref<1x32xf32, #tpu.memory_space<vmem>>, %arg12: memref<1x32xf32, #tpu.memory_space<vmem>>, %arg13: memref<1x32xf32, #tpu.memory_space<vmem>>, %arg14: memref<1x8x32xbf16, #tpu.memory_space<vmem>>, %arg15: memref<1x8x32xf32, #tpu.memory_space<vmem>>) attributes {dimension_semantics = [#tpu.dimension_semantics<parallel>], iteration_bounds = array<i64: 2>, scalar_prefetch = 0 : i64, scratch_operands = 1 : i64, tpu.core_type = #tpu.core_type<tc>, window_params = [{transform_indices = @transform_0, window_bounds = array<i64: 1, 8, 32>}, {pipeline_mode = #tpu.pipeline_mode<synchronous>, transform_indices = @transform_1, window_bounds = array<i64: 32, 96>}, {pipeline_mode = #tpu.pipeline_mode<synchronous>, transform_indices = @transform_2, window_bounds = array<i64: 1, 96>}, {pipeline_mode = #tpu.pipeline_mode<synchronous>, transform_indices = @transform_3, window_bounds = array<i64: 32, 32>}, {pipeline_mode = #tpu.pipeline_mode<synchronous>, transform_indices = @transform_4, window_bounds = array<i64: 1, 32>}, {pipeline_mode = #tpu.pipeline_mode<synchronous>, transform_indices = @transform_5, window_bounds = array<i64: 1, 32>}, {pipeline_mode = #tpu.pipeline_mode<synchronous>, transform_indices = @transform_6, window_bounds = array<i64: 1, 32>}, {pipeline_mode = #tpu.pipeline_mode<synchronous>, transform_indices = @transform_7, window_bounds = array<i64: 32, 64>}, {pipeline_mode = #tpu.pipeline_mode<synchronous>, transform_indices = @transform_8, window_bounds = array<i64: 1, 64>}, {pipeline_mode = #tpu.pipeline_mode<synchronous>, transform_indices = @transform_9, window_bounds = array<i64: 64, 32>}, {pipeline_mode = #tpu.pipeline_mode<synchronous>, transform_indices = @transform_10, window_bounds = array<i64: 1, 32>}, {pipeline_mode = #tpu.pipeline_mode<synchronous>, transform_indices = @transform_11, window_bounds = array<i64: 1, 32>}, {pipeline_mode = #tpu.pipeline_mode<synchronous>, transform_indices = @transform_12, window_bounds = array<i64: 1, 32>}, {transform_indices = @transform_13, window_bounds = array<i64: 1, 8, 32>}]} {
    %c0 = arith.constant 0 : index
    %c0_0 = arith.constant 0 : index
    %c0_1 = arith.constant 0 : index
    %0 = vector.load %arg1[%c0, %c0_0, %c0_1] : memref<1x8x32xbf16, #tpu.memory_space<vmem>>, vector<1x8x32xbf16>
    %1 = arith.extf %0 : vector<1x8x32xbf16> to vector<1x8x32xf32>
    %2 = vector.shape_cast %1 : vector<1x8x32xf32> to vector<8x32xf32>
    %3 = arith.truncf %2 : vector<8x32xf32> to vector<8x32xbf16>
    %c0_2 = arith.constant 0 : index
    %c0_3 = arith.constant 0 : index
    %4 = vector.load %arg2[%c0_2, %c0_3] : memref<32x96xbf16, #tpu.memory_space<vmem>>, vector<32x96xbf16>
    %cst = arith.constant dense<0.000000e+00> : vector<8x96xf32>
    %5 = tpu.matmul %3, %4, %cst {dimension_numbers = #tpu.dot_dimension_numbers<[1], [0], [0], [1], [0, 0, 1, 1], [], []>} : vector<8x32xbf16>, vector<32x96xbf16>, vector<8x96xf32> -> vector<8x96xf32>
    %c0_4 = arith.constant 0 : index
    %c0_5 = arith.constant 0 : index
    %6 = vector.load %arg3[%c0_4, %c0_5] : memref<1x96xf32, #tpu.memory_space<vmem>>, vector<1x96xf32>
    %7 = vector.broadcast %6 : vector<1x96xf32> to vector<8x96xf32>
    %8 = arith.addf %5, %7 : vector<8x96xf32>
    %9 = vector.shape_cast %8 : vector<8x96xf32> to vector<1x8x96xf32>
    %10 = vector.extract_strided_slice %9 {offsets = [0, 0, 0], sizes = [1, 8, 8], strides = [1, 1, 1]} : vector<1x8x96xf32> to vector<1x8x8xf32>
    %11 = arith.truncf %10 : vector<1x8x8xf32> to vector<1x8x8xbf16>
    %12 = vector.extract_strided_slice %9 {offsets = [0, 0, 32], sizes = [1, 8, 8], strides = [1, 1, 1]} : vector<1x8x96xf32> to vector<1x8x8xf32>
    %13 = arith.truncf %12 : vector<1x8x8xf32> to vector<1x8x8xbf16>
    %14 = vector.extract_strided_slice %9 {offsets = [0, 0, 64], sizes = [1, 8, 8], strides = [1, 1, 1]} : vector<1x8x96xf32> to vector<1x8x8xf32>
    %15 = arith.truncf %14 : vector<1x8x8xf32> to vector<1x8x8xbf16>
    "tpu.trace_start"() <{level = 10 : i32, message = "bqd,bkd->bqk"}> : () -> ()
    %cst_6 = arith.constant dense<0.000000e+00> : vector<1x8x8xf32>
    %16 = tpu.matmul %11, %13, %cst_6 {dimension_numbers = #tpu.dot_dimension_numbers<[2], [2], [1], [1], [0, 0, 0, 1, 1, 1], [0], [0]>} : vector<1x8x8xbf16>, vector<1x8x8xbf16>, vector<1x8x8xf32> -> vector<1x8x8xf32>
    "tpu.trace_stop"() : () -> ()
    %cst_7 = arith.constant 0.353553385 : f32
    %17 = vector.broadcast %cst_7 : f32 to vector<1x8x8xf32>
    %18 = arith.mulf %16, %17 : vector<1x8x8xf32>
    %cst_8 = arith.constant dense<0xFF800000> : vector<1x8xf32>
    %19 = vector.multi_reduction <maximumf>, %18, %cst_8 [2] : vector<1x8x8xf32> to vector<1x8xf32>
    %20 = vector.shape_cast %19 : vector<1x8xf32> to vector<1x8x1xf32>
    %21 = vector.broadcast %20 : vector<1x8x1xf32> to vector<1x8x8xf32>
    %22 = arith.subf %18, %21 : vector<1x8x8xf32>
    %23 = math.exp %22 : vector<1x8x8xf32>
    %cst_9 = arith.constant dense<0.000000e+00> : vector<1x8xf32>
    %24 = vector.multi_reduction <add>, %23, %cst_9 [2] : vector<1x8x8xf32> to vector<1x8xf32>
    %25 = vector.shape_cast %24 : vector<1x8xf32> to vector<1x8x1xf32>
    %26 = tpu.reciprocal %25 {approx = true} : vector<1x8x1xf32> -> vector<1x8x1xf32>
    %27 = vector.broadcast %26 : vector<1x8x1xf32> to vector<1x8x8xf32>
    %28 = arith.mulf %23, %27 : vector<1x8x8xf32>
    %29 = arith.truncf %28 : vector<1x8x8xf32> to vector<1x8x8xbf16>
    "tpu.trace_start"() <{level = 10 : i32, message = "bqk,bkd->bqd"}> : () -> ()
    %cst_10 = arith.constant dense<0.000000e+00> : vector<1x8x8xf32>
    %30 = tpu.matmul %29, %15, %cst_10 {dimension_numbers = #tpu.dot_dimension_numbers<[2], [1], [1], [2], [0, 0, 0, 1, 1, 2], [0], [0]>} : vector<1x8x8xbf16>, vector<1x8x8xbf16>, vector<1x8x8xf32> -> vector<1x8x8xf32>
    "tpu.trace_stop"() : () -> ()
    %c0_11 = arith.constant 0 : index
    %c0_12 = arith.constant 0 : index
    %c0_13 = arith.constant 0 : index
    %31 = vector.load %arg15[%c0_11, %c0_12, %c0_13] : memref<1x8x32xf32, #tpu.memory_space<vmem>>, vector<1x8x8xf32>
    tpu.vector_store %arg15[%c0_11, %c0_12, %c0_13], %30 {strides = array<i32>} : memref<1x8x32xf32, #tpu.memory_space<vmem>>, vector<1x8x8xf32>,
    %32 = vector.extract_strided_slice %9 {offsets = [0, 0, 8], sizes = [1, 8, 8], strides = [1, 1, 1]} : vector<1x8x96xf32> to vector<1x8x8xf32>
    %33 = arith.truncf %32 : vector<1x8x8xf32> to vector<1x8x8xbf16>
    %34 = vector.extract_strided_slice %9 {offsets = [0, 0, 40], sizes = [1, 8, 8], strides = [1, 1, 1]} : vector<1x8x96xf32> to vector<1x8x8xf32>
    %35 = arith.truncf %34 : vector<1x8x8xf32> to vector<1x8x8xbf16>
    %36 = vector.extract_strided_slice %9 {offsets = [0, 0, 72], sizes = [1, 8, 8], strides = [1, 1, 1]} : vector<1x8x96xf32> to vector<1x8x8xf32>
    %37 = arith.truncf %36 : vector<1x8x8xf32> to vector<1x8x8xbf16>
    "tpu.trace_start"() <{level = 10 : i32, message = "bqd,bkd->bqk"}> : () -> ()
    %cst_14 = arith.constant dense<0.000000e+00> : vector<1x8x8xf32>
    %38 = tpu.matmul %33, %35, %cst_14 {dimension_numbers = #tpu.dot_dimension_numbers<[2], [2], [1], [1], [0, 0, 0, 1, 1, 1], [0], [0]>} : vector<1x8x8xbf16>, vector<1x8x8xbf16>, vector<1x8x8xf32> -> vector<1x8x8xf32>
    "tpu.trace_stop"() : () -> ()
    %cst_15 = arith.constant 0.353553385 : f32
    %39 = vector.broadcast %cst_15 : f32 to vector<1x8x8xf32>
    %40 = arith.mulf %38, %39 : vector<1x8x8xf32>
    %cst_16 = arith.constant dense<0xFF800000> : vector<1x8xf32>
    %41 = vector.multi_reduction <maximumf>, %40, %cst_16 [2] : vector<1x8x8xf32> to vector<1x8xf32>
    %42 = vector.shape_cast %41 : vector<1x8xf32> to vector<1x8x1xf32>
    %43 = vector.broadcast %42 : vector<1x8x1xf32> to vector<1x8x8xf32>
    %44 = arith.subf %40, %43 : vector<1x8x8xf32>
    %45 = math.exp %44 : vector<1x8x8xf32>
    %cst_17 = arith.constant dense<0.000000e+00> : vector<1x8xf32>
    %46 = vector.multi_reduction <add>, %45, %cst_17 [2] : vector<1x8x8xf32> to vector<1x8xf32>
    %47 = vector.shape_cast %46 : vector<1x8xf32> to vector<1x8x1xf32>
    %48 = tpu.reciprocal %47 {approx = true} : vector<1x8x1xf32> -> vector<1x8x1xf32>
    %49 = vector.broadcast %48 : vector<1x8x1xf32> to vector<1x8x8xf32>
    %50 = arith.mulf %45, %49 : vector<1x8x8xf32>
    %51 = arith.truncf %50 : vector<1x8x8xf32> to vector<1x8x8xbf16>
    "tpu.trace_start"() <{level = 10 : i32, message = "bqk,bkd->bqd"}> : () -> ()
    %cst_18 = arith.constant dense<0.000000e+00> : vector<1x8x8xf32>
    %52 = tpu.matmul %51, %37, %cst_18 {dimension_numbers = #tpu.dot_dimension_numbers<[2], [1], [1], [2], [0, 0, 0, 1, 1, 2], [0], [0]>} : vector<1x8x8xbf16>, vector<1x8x8xbf16>, vector<1x8x8xf32> -> vector<1x8x8xf32>
    "tpu.trace_stop"() : () -> ()
    %c0_19 = arith.constant 0 : index
    %c0_20 = arith.constant 0 : index
    %c8 = arith.constant 8 : index
    %53 = vector.load %arg15[%c0_19, %c0_20, %c8] : memref<1x8x32xf32, #tpu.memory_space<vmem>>, vector<1x8x8xf32>
    tpu.vector_store %arg15[%c0_19, %c0_20, %c8], %52 {strides = array<i32>} : memref<1x8x32xf32, #tpu.memory_space<vmem>>, vector<1x8x8xf32>,
    %54 = vector.extract_strided_slice %9 {offsets = [0, 0, 16], sizes = [1, 8, 8], strides = [1, 1, 1]} : vector<1x8x96xf32> to vector<1x8x8xf32>
    %55 = arith.truncf %54 : vector<1x8x8xf32> to vector<1x8x8xbf16>
    %56 = vector.extract_strided_slice %9 {offsets = [0, 0, 48], sizes = [1, 8, 8], strides = [1, 1, 1]} : vector<1x8x96xf32> to vector<1x8x8xf32>
    %57 = arith.truncf %56 : vector<1x8x8xf32> to vector<1x8x8xbf16>
    %58 = vector.extract_strided_slice %9 {offsets = [0, 0, 80], sizes = [1, 8, 8], strides = [1, 1, 1]} : vector<1x8x96xf32> to vector<1x8x8xf32>
    %59 = arith.truncf %58 : vector<1x8x8xf32> to vector<1x8x8xbf16>
    "tpu.trace_start"() <{level = 10 : i32, message = "bqd,bkd->bqk"}> : () -> ()
    %cst_21 = arith.constant dense<0.000000e+00> : vector<1x8x8xf32>
    %60 = tpu.matmul %55, %57, %cst_21 {dimension_numbers = #tpu.dot_dimension_numbers<[2], [2], [1], [1], [0, 0, 0, 1, 1, 1], [0], [0]>} : vector<1x8x8xbf16>, vector<1x8x8xbf16>, vector<1x8x8xf32> -> vector<1x8x8xf32>
    "tpu.trace_stop"() : () -> ()
    %cst_22 = arith.constant 0.353553385 : f32
    %61 = vector.broadcast %cst_22 : f32 to vector<1x8x8xf32>
    %62 = arith.mulf %60, %61 : vector<1x8x8xf32>
    %cst_23 = arith.constant dense<0xFF800000> : vector<1x8xf32>
    %63 = vector.multi_reduction <maximumf>, %62, %cst_23 [2] : vector<1x8x8xf32> to vector<1x8xf32>
    %64 = vector.shape_cast %63 : vector<1x8xf32> to vector<1x8x1xf32>
    %65 = vector.broadcast %64 : vector<1x8x1xf32> to vector<1x8x8xf32>
    %66 = arith.subf %62, %65 : vector<1x8x8xf32>
    %67 = math.exp %66 : vector<1x8x8xf32>
    %cst_24 = arith.constant dense<0.000000e+00> : vector<1x8xf32>
    %68 = vector.multi_reduction <add>, %67, %cst_24 [2] : vector<1x8x8xf32> to vector<1x8xf32>
    %69 = vector.shape_cast %68 : vector<1x8xf32> to vector<1x8x1xf32>
    %70 = tpu.reciprocal %69 {approx = true} : vector<1x8x1xf32> -> vector<1x8x1xf32>
    %71 = vector.broadcast %70 : vector<1x8x1xf32> to vector<1x8x8xf32>
    %72 = arith.mulf %67, %71 : vector<1x8x8xf32>
    %73 = arith.truncf %72 : vector<1x8x8xf32> to vector<1x8x8xbf16>
    "tpu.trace_start"() <{level = 10 : i32, message = "bqk,bkd->bqd"}> : () -> ()
    %cst_25 = arith.constant dense<0.000000e+00> : vector<1x8x8xf32>
    %74 = tpu.matmul %73, %59, %cst_25 {dimension_numbers = #tpu.dot_dimension_numbers<[2], [1], [1], [2], [0, 0, 0, 1, 1, 2], [0], [0]>} : vector<1x8x8xbf16>, vector<1x8x8xbf16>, vector<1x8x8xf32> -> vector<1x8x8xf32>
    "tpu.trace_stop"() : () -> ()
    %c0_26 = arith.constant 0 : index
    %c0_27 = arith.constant 0 : index
    %c16 = arith.constant 16 : index
    %75 = vector.load %arg15[%c0_26, %c0_27, %c16] : memref<1x8x32xf32, #tpu.memory_space<vmem>>, vector<1x8x8xf32>
    tpu.vector_store %arg15[%c0_26, %c0_27, %c16], %74 {strides = array<i32>} : memref<1x8x32xf32, #tpu.memory_space<vmem>>, vector<1x8x8xf32>,
    %76 = vector.extract_strided_slice %9 {offsets = [0, 0, 24], sizes = [1, 8, 8], strides = [1, 1, 1]} : vector<1x8x96xf32> to vector<1x8x8xf32>
    %77 = arith.truncf %76 : vector<1x8x8xf32> to vector<1x8x8xbf16>
    %78 = vector.extract_strided_slice %9 {offsets = [0, 0, 56], sizes = [1, 8, 8], strides = [1, 1, 1]} : vector<1x8x96xf32> to vector<1x8x8xf32>
    %79 = arith.truncf %78 : vector<1x8x8xf32> to vector<1x8x8xbf16>
    %80 = vector.extract_strided_slice %9 {offsets = [0, 0, 88], sizes = [1, 8, 8], strides = [1, 1, 1]} : vector<1x8x96xf32> to vector<1x8x8xf32>
    %81 = arith.truncf %80 : vector<1x8x8xf32> to vector<1x8x8xbf16>
    "tpu.trace_start"() <{level = 10 : i32, message = "bqd,bkd->bqk"}> : () -> ()
    %cst_28 = arith.constant dense<0.000000e+00> : vector<1x8x8xf32>
    %82 = tpu.matmul %77, %79, %cst_28 {dimension_numbers = #tpu.dot_dimension_numbers<[2], [2], [1], [1], [0, 0, 0, 1, 1, 1], [0], [0]>} : vector<1x8x8xbf16>, vector<1x8x8xbf16>, vector<1x8x8xf32> -> vector<1x8x8xf32>
    "tpu.trace_stop"() : () -> ()
    %cst_29 = arith.constant 0.353553385 : f32
    %83 = vector.broadcast %cst_29 : f32 to vector<1x8x8xf32>
    %84 = arith.mulf %82, %83 : vector<1x8x8xf32>
    %cst_30 = arith.constant dense<0xFF800000> : vector<1x8xf32>
    %85 = vector.multi_reduction <maximumf>, %84, %cst_30 [2] : vector<1x8x8xf32> to vector<1x8xf32>
    %86 = vector.shape_cast %85 : vector<1x8xf32> to vector<1x8x1xf32>
    %87 = vector.broadcast %86 : vector<1x8x1xf32> to vector<1x8x8xf32>
    %88 = arith.subf %84, %87 : vector<1x8x8xf32>
    %89 = math.exp %88 : vector<1x8x8xf32>
    %cst_31 = arith.constant dense<0.000000e+00> : vector<1x8xf32>
    %90 = vector.multi_reduction <add>, %89, %cst_31 [2] : vector<1x8x8xf32> to vector<1x8xf32>
    %91 = vector.shape_cast %90 : vector<1x8xf32> to vector<1x8x1xf32>
    %92 = tpu.reciprocal %91 {approx = true} : vector<1x8x1xf32> -> vector<1x8x1xf32>
    %93 = vector.broadcast %92 : vector<1x8x1xf32> to vector<1x8x8xf32>
    %94 = arith.mulf %89, %93 : vector<1x8x8xf32>
    %95 = arith.truncf %94 : vector<1x8x8xf32> to vector<1x8x8xbf16>
    "tpu.trace_start"() <{level = 10 : i32, message = "bqk,bkd->bqd"}> : () -> ()
    %cst_32 = arith.constant dense<0.000000e+00> : vector<1x8x8xf32>
    %96 = tpu.matmul %95, %81, %cst_32 {dimension_numbers = #tpu.dot_dimension_numbers<[2], [1], [1], [2], [0, 0, 0, 1, 1, 2], [0], [0]>} : vector<1x8x8xbf16>, vector<1x8x8xbf16>, vector<1x8x8xf32> -> vector<1x8x8xf32>
    "tpu.trace_stop"() : () -> ()
    %c0_33 = arith.constant 0 : index
    %c0_34 = arith.constant 0 : index
    %c24 = arith.constant 24 : index
    %97 = vector.load %arg15[%c0_33, %c0_34, %c24] : memref<1x8x32xf32, #tpu.memory_space<vmem>>, vector<1x8x8xf32>
    tpu.vector_store %arg15[%c0_33, %c0_34, %c24], %96 {strides = array<i32>} : memref<1x8x32xf32, #tpu.memory_space<vmem>>, vector<1x8x8xf32>,
    %c0_35 = arith.constant 0 : index
    %c0_36 = arith.constant 0 : index
    %c0_37 = arith.constant 0 : index
    %98 = vector.load %arg15[%c0_35, %c0_36, %c0_37] : memref<1x8x32xf32, #tpu.memory_space<vmem>>, vector<1x8x32xf32>
    %99 = vector.shape_cast %98 : vector<1x8x32xf32> to vector<8x32xf32>
    %100 = arith.truncf %99 : vector<8x32xf32> to vector<8x32xbf16>
    %c0_38 = arith.constant 0 : index
    %c0_39 = arith.constant 0 : index
    %101 = vector.load %arg4[%c0_38, %c0_39] : memref<32x32xbf16, #tpu.memory_space<vmem>>, vector<32x32xbf16>
    %cst_40 = arith.constant dense<0.000000e+00> : vector<8x32xf32>
    %102 = tpu.matmul %100, %101, %cst_40 {dimension_numbers = #tpu.dot_dimension_numbers<[1], [0], [0], [1], [0, 0, 1, 1], [], []>} : vector<8x32xbf16>, vector<32x32xbf16>, vector<8x32xf32> -> vector<8x32xf32>
    %c0_41 = arith.constant 0 : index
    %c0_42 = arith.constant 0 : index
    %103 = vector.load %arg5[%c0_41, %c0_42] : memref<1x32xf32, #tpu.memory_space<vmem>>, vector<1x32xf32>
    %104 = vector.broadcast %103 : vector<1x32xf32> to vector<8x32xf32>
    %105 = arith.addf %102, %104 : vector<8x32xf32>
    %106 = arith.addf %2, %105 : vector<8x32xf32>
    %cst_43 = arith.constant dense<0.000000e+00> : vector<8xf32>
    %107 = vector.multi_reduction <add>, %106, %cst_43 [1] : vector<8x32xf32> to vector<8xf32>
    %108 = vector.shape_cast %107 : vector<8xf32> to vector<8x1xf32>
    %cst_44 = arith.constant 3.200000e+01 : f32
    %109 = vector.broadcast %cst_44 : f32 to vector<8x1xf32>
    %110 = arith.divf %108, %109 : vector<8x1xf32>
    %111 = vector.broadcast %110 : vector<8x1xf32> to vector<8x32xf32>
    %112 = arith.subf %106, %111 : vector<8x32xf32>
    %113 = arith.mulf %112, %112 : vector<8x32xf32>
    %cst_45 = arith.constant dense<0.000000e+00> : vector<8xf32>
    %114 = vector.multi_reduction <add>, %113, %cst_45 [1] : vector<8x32xf32> to vector<8xf32>
    %115 = vector.shape_cast %114 : vector<8xf32> to vector<8x1xf32>
    %cst_46 = arith.constant 3.200000e+01 : f32
    %116 = vector.broadcast %cst_46 : f32 to vector<8x1xf32>
    %117 = arith.divf %115, %116 : vector<8x1xf32>
    %118 = vector.broadcast %110 : vector<8x1xf32> to vector<8x32xf32>
    %119 = arith.subf %106, %118 : vector<8x32xf32>
    %cst_47 = arith.constant 9.99999974E-6 : f32
    %120 = vector.broadcast %cst_47 : f32 to vector<8x1xf32>
    %121 = arith.addf %117, %120 : vector<8x1xf32>
    %122 = math.rsqrt %121 : vector<8x1xf32>
    %123 = vector.broadcast %122 : vector<8x1xf32> to vector<8x32xf32>
    %124 = arith.mulf %119, %123 : vector<8x32xf32>
    %c0_48 = arith.constant 0 : index
    %c0_49 = arith.constant 0 : index
    %125 = vector.load %arg6[%c0_48, %c0_49] : memref<1x32xf32, #tpu.memory_space<vmem>>, vector<1x32xf32>
    %126 = vector.broadcast %125 : vector<1x32xf32> to vector<8x32xf32>
    %127 = arith.mulf %124, %126 : vector<8x32xf32>
    %c0_50 = arith.constant 0 : index
    %c0_51 = arith.constant 0 : index
    %128 = vector.load %arg7[%c0_50, %c0_51] : memref<1x32xf32, #tpu.memory_space<vmem>>, vector<1x32xf32>
    %129 = vector.broadcast %128 : vector<1x32xf32> to vector<8x32xf32>
    %130 = arith.addf %127, %129 : vector<8x32xf32>
    %131 = arith.truncf %130 : vector<8x32xf32> to vector<8x32xbf16>
    %c0_52 = arith.constant 0 : index
    %c0_53 = arith.constant 0 : index
    %132 = vector.load %arg8[%c0_52, %c0_53] : memref<32x64xbf16, #tpu.memory_space<vmem>>, vector<32x64xbf16>
    %cst_54 = arith.constant dense<0.000000e+00> : vector<8x64xf32>
    %133 = tpu.matmul %131, %132, %cst_54 {dimension_numbers = #tpu.dot_dimension_numbers<[1], [0], [0], [1], [0, 0, 1, 1], [], []>} : vector<8x32xbf16>, vector<32x64xbf16>, vector<8x64xf32> -> vector<8x64xf32>
    %c0_55 = arith.constant 0 : index
    %c0_56 = arith.constant 0 : index
    %134 = vector.load %arg9[%c0_55, %c0_56] : memref<1x64xf32, #tpu.memory_space<vmem>>, vector<1x64xf32>
    %135 = vector.broadcast %134 : vector<1x64xf32> to vector<8x64xf32>
    %136 = arith.addf %133, %135 : vector<8x64xf32>
    %cst_57 = arith.constant 0.000000e+00 : f32
    %137 = vector.broadcast %cst_57 : f32 to vector<8x64xf32>
    %138 = arith.maximumf %136, %137 : vector<8x64xf32>
    %139 = arith.truncf %138 : vector<8x64xf32> to vector<8x64xbf16>
    %c0_58 = arith.constant 0 : index
    %c0_59 = arith.constant 0 : index
    %140 = vector.load %arg10[%c0_58, %c0_59] : memref<64x32xbf16, #tpu.memory_space<vmem>>, vector<64x32xbf16>
    %cst_60 = arith.constant dense<0.000000e+00> : vector<8x32xf32>
    %141 = tpu.matmul %139, %140, %cst_60 {dimension_numbers = #tpu.dot_dimension_numbers<[1], [0], [0], [1], [0, 0, 1, 1], [], []>} : vector<8x64xbf16>, vector<64x32xbf16>, vector<8x32xf32> -> vector<8x32xf32>
    %c0_61 = arith.constant 0 : index
    %c0_62 = arith.constant 0 : index
    %142 = vector.load %arg11[%c0_61, %c0_62] : memref<1x32xf32, #tpu.memory_space<vmem>>, vector<1x32xf32>
    %143 = vector.broadcast %142 : vector<1x32xf32> to vector<8x32xf32>
    %144 = arith.addf %141, %143 : vector<8x32xf32>
    %145 = arith.addf %130, %144 : vector<8x32xf32>
    %cst_63 = arith.constant dense<0.000000e+00> : vector<8xf32>
    %146 = vector.multi_reduction <add>, %145, %cst_63 [1] : vector<8x32xf32> to vector<8xf32>
    %147 = vector.shape_cast %146 : vector<8xf32> to vector<8x1xf32>
    %cst_64 = arith.constant 3.200000e+01 : f32
    %148 = vector.broadcast %cst_64 : f32 to vector<8x1xf32>
    %149 = arith.divf %147, %148 : vector<8x1xf32>
    %150 = vector.broadcast %149 : vector<8x1xf32> to vector<8x32xf32>
    %151 = arith.subf %145, %150 : vector<8x32xf32>
    %152 = arith.mulf %151, %151 : vector<8x32xf32>
    %cst_65 = arith.constant dense<0.000000e+00> : vector<8xf32>
    %153 = vector.multi_reduction <add>, %152, %cst_65 [1] : vector<8x32xf32> to vector<8xf32>
    %154 = vector.shape_cast %153 : vector<8xf32> to vector<8x1xf32>
    %cst_66 = arith.constant 3.200000e+01 : f32
    %155 = vector.broadcast %cst_66 : f32 to vector<8x1xf32>
    %156 = arith.divf %154, %155 : vector<8x1xf32>
    %157 = vector.broadcast %149 : vector<8x1xf32> to vector<8x32xf32>
    %158 = arith.subf %145, %157 : vector<8x32xf32>
    %cst_67 = arith.constant 9.99999974E-6 : f32
    %159 = vector.broadcast %cst_67 : f32 to vector<8x1xf32>
    %160 = arith.addf %156, %159 : vector<8x1xf32>
    %161 = math.rsqrt %160 : vector<8x1xf32>
    %162 = vector.broadcast %161 : vector<8x1xf32> to vector<8x32xf32>
    %163 = arith.mulf %158, %162 : vector<8x32xf32>
    %c0_68 = arith.constant 0 : index
    %c0_69 = arith.constant 0 : index
    %164 = vector.load %arg12[%c0_68, %c0_69] : memref<1x32xf32, #tpu.memory_space<vmem>>, vector<1x32xf32>
    %165 = vector.broadcast %164 : vector<1x32xf32> to vector<8x32xf32>
    %166 = arith.mulf %163, %165 : vector<8x32xf32>
    %c0_70 = arith.constant 0 : index
    %c0_71 = arith.constant 0 : index
    %167 = vector.load %arg13[%c0_70, %c0_71] : memref<1x32xf32, #tpu.memory_space<vmem>>, vector<1x32xf32>
    %168 = vector.broadcast %167 : vector<1x32xf32> to vector<8x32xf32>
    %169 = arith.addf %166, %168 : vector<8x32xf32>
    %170 = vector.shape_cast %169 : vector<8x32xf32> to vector<1x8x32xf32>
    %171 = arith.truncf %170 : vector<1x8x32xf32> to vector<1x8x32xbf16>
    %c0_72 = arith.constant 0 : index
    %c0_73 = arith.constant 0 : index
    %c0_74 = arith.constant 0 : index
    %172 = vector.load %arg14[%c0_72, %c0_73, %c0_74] : memref<1x8x32xbf16, #tpu.memory_space<vmem>>, vector<1x8x32xbf16>
    tpu.vector_store %arg14[%c0_72, %c0_73, %c0_74], %171 {strides = array<i32>} : memref<1x8x32xbf16, #tpu.memory_space<vmem>>, vector<1x8x32xbf16>,
    return
  }
  func.func @transform_0(%arg0: i32) -> (i32, i32, i32) {
    %c0_i32 = arith.constant 0 : i32
    %c0_i32_0 = arith.constant 0 : i32
    %c0_i32_1 = arith.constant 0 : i32
    return %arg0, %c0_i32, %c0_i32_0 : i32, i32, i32
  }
  func.func @transform_1(%arg0: i32) -> (i32, i32) {
    %c0_i32 = arith.constant 0 : i32
    %c0_i32_0 = arith.constant 0 : i32
    %c0_i32_1 = arith.constant 0 : i32
    return %c0_i32, %c0_i32_0 : i32, i32
  }
  func.func @transform_2(%arg0: i32) -> (i32, i32) {
    %c0_i32 = arith.constant 0 : i32
    %c0_i32_0 = arith.constant 0 : i32
    %c0_i32_1 = arith.constant 0 : i32
    return %c0_i32, %c0_i32_0 : i32, i32
  }
  func.func @transform_3(%arg0: i32) -> (i32, i32) {
    %c0_i32 = arith.constant 0 : i32
    %c0_i32_0 = arith.constant 0 : i32
    %c0_i32_1 = arith.constant 0 : i32
    return %c0_i32, %c0_i32_0 : i32, i32
  }
  func.func @transform_4(%arg0: i32) -> (i32, i32) {
    %c0_i32 = arith.constant 0 : i32
    %c0_i32_0 = arith.constant 0 : i32
    %c0_i32_1 = arith.constant 0 : i32
    return %c0_i32, %c0_i32_0 : i32, i32
  }
  func.func @transform_5(%arg0: i32) -> (i32, i32) {
    %c0_i32 = arith.constant 0 : i32
    %c0_i32_0 = arith.constant 0 : i32
    %c0_i32_1 = arith.constant 0 : i32
    return %c0_i32, %c0_i32_0 : i32, i32
  }
  func.func @transform_6(%arg0: i32) -> (i32, i32) {
    %c0_i32 = arith.constant 0 : i32
    %c0_i32_0 = arith.constant 0 : i32
    %c0_i32_1 = arith.constant 0 : i32
    return %c0_i32, %c0_i32_0 : i32, i32
  }
  func.func @transform_7(%arg0: i32) -> (i32, i32) {
    %c0_i32 = arith.constant 0 : i32
    %c0_i32_0 = arith.constant 0 : i32
    %c0_i32_1 = arith.constant 0 : i32
    return %c0_i32, %c0_i32_0 : i32, i32
  }
  func.func @transform_8(%arg0: i32) -> (i32, i32) {
    %c0_i32 = arith.constant 0 : i32
    %c0_i32_0 = arith.constant 0 : i32
    %c0_i32_1 = arith.constant 0 : i32
    return %c0_i32, %c0_i32_0 : i32, i32
  }
  func.func @transform_9(%arg0: i32) -> (i32, i32) {
    %c0_i32 = arith.constant 0 : i32
    %c0_i32_0 = arith.constant 0 : i32
    %c0_i32_1 = arith.constant 0 : i32
    return %c0_i32, %c0_i32_0 : i32, i32
  }
  func.func @transform_10(%arg0: i32) -> (i32, i32) {
    %c0_i32 = arith.constant 0 : i32
    %c0_i32_0 = arith.constant 0 : i32
    %c0_i32_1 = arith.constant 0 : i32
    return %c0_i32, %c0_i32_0 : i32, i32
  }
  func.func @transform_11(%arg0: i32) -> (i32, i32) {
    %c0_i32 = arith.constant 0 : i32
    %c0_i32_0 = arith.constant 0 : i32
    %c0_i32_1 = arith.constant 0 : i32
    return %c0_i32, %c0_i32_0 : i32, i32
  }
  func.func @transform_12(%arg0: i32) -> (i32, i32) {
    %c0_i32 = arith.constant 0 : i32
    %c0_i32_0 = arith.constant 0 : i32
    %c0_i32_1 = arith.constant 0 : i32
    return %c0_i32, %c0_i32_0 : i32, i32
  }
  func.func @transform_13(%arg0: i32) -> (i32, i32, i32) {
    %c0_i32 = arith.constant 0 : i32
    %c0_i32_0 = arith.constant 0 : i32
    %c0_i32_1 = arith.constant 0 : i32
    return %arg0, %c0_i32, %c0_i32_0 : i32, i32, i32
  }
}

</mosaic_0001>

<bundles_post_ra>
// kernel: simple_transformer_forward.5
= control target key start
LH: loop header
LB: loop body
LE: loop exit
PB: predicated region body
PF: predicated region fallthrough
CT: control target
= control target key end

     0   :  { %v117_v0 = vmov 0.0   ;;  %vm118_vm0 = vmmov 0   ;;  %vm45_vm1 = vcmask 261120   ;;  %s157_s1 = inlined_call_operand.vmem [shape: bf16[32,128], index: 1, kind: input, shape index: {}]   ;;  %s158_s0 = inlined_call_operand.vmem [shape: bf16[16,32], index: 0, kind: input, shape index: {}]   ;;  %s159_s2 = inlined_call_operand.vmem [shape: f32[1,128], index: 2, kind: input, shape index: {}]   ;;  %s160_s3 = inlined_call_operand.vmem [shape: f32[16,128], index: 3, kind: output, shape index: {}]  }
   0x1   :  { %104 = vmatprep.subr.bf16.mxu0 %v117_v0  ;;  %v114_v1 = vld [vmem:[%s157_s1] sm:$0xff]   ;;  %108 = vmatprep.mubr.msk.bf16.mxu0 %vm118_vm0, %v117_v0  ;;  %v115_v2 = vld [vmem:[%s157_s1 + $0x8] sm:$0xff]  }
   0x2   :  { %105 = vmatpush3.bf16.msra.mxu0 %v114_v1  ;;  %v116_v3 = vld [vmem:[%s158_s0] sm:$0xff]  }
   0x3   :  { %106 = vmatprep.subr.bf16.mxu0 %v117_v0  ;;  %v96_v4 = vld [vmem:[%s159_s2] ss:$0 sm:$0xff] }
   0x6   :  { %107 = vmatpush3.bf16.msra.mxu0 %v115_v2 }
   0x9   :  { %109 = vmatmul.mubr.msk.bf16.vlgmr.msra.gmra.mrb[0].mxu0 %vm45_vm1, %v116_v3 }
  0xdc   :  { %v83_v5 = vpop.f32.mrb[0].mxu0 }
  0xdd   :  { %v84_v6 = vadd.f32 %v96_v4, %v83_v5  ;;  %v110_v7 = vpop.f32.mrb[1].mxu0 }
  0xde   :  { %v86_v8 = vpop.f32.mrb[2].mxu0 }
  0xdf   :  { %90 = vst [vmem:[%s160_s3] sm:$0xff] %v84_v6  ;;  %v87_v9 = vadd.f32 %v96_v4, %v86_v8  ;;  %v111_v10 = vpop.f32.mrb[3].mxu0 }
  0xe1   :  { %91 = vst [vmem:[%s160_s3 + $0x8] sm:$0xff] %v87_v9 }

// kernel: simple_transformer_forward.3
= control target key start
LH: loop header
LB: loop body
LE: loop exit
PB: predicated region body
PF: predicated region fallthrough
CT: control target
= control target key end

     0   :  { %s1612_s25 = smov 0   ;;  %s1783_s0 = inlined_call_operand.vmem [shape: bf16[2,8,32], index: 0, kind: input, shape index: {}]   ;;  %s1784_s1 = inlined_call_operand.vmem [shape: bf16[32,96], index: 1, kind: input, shape index: {}]   ;;  %s1785_s2 = inlined_call_operand.vmem [shape: f32[1,96], index: 2, kind: input, shape index: {}]   ;;  %s1786_s3 = inlined_call_operand.vmem [shape: bf16[32,32], index: 3, kind: input, shape index: {}]   ;;  %s1787_s4 = inlined_call_operand.vmem [shape: f32[1,32], index: 4, kind: input, shape index: {}]   ;;  %s1788_s5 = inlined_call_operand.vmem [shape: f32[1,32], index: 5, kind: input, shape index: {}]   ;;  %s1789_s6 = inlined_call_operand.vmem [shape: f32[1,32], index: 6, kind: input, shape index: {}]   ;;  %s1790_s7 = inlined_call_operand.vmem [shape: bf16[32,64], index: 7, kind: input, shape index: {}]   ;;  %s1791_s8 = inlined_call_operand.vmem [shape: f32[1,64], index: 8, kind: input, shape index: {}]   ;;  %s1792_s9 = inlined_call_operand.vmem [shape: bf16[64,32], index: 9, kind: input, shape index: {}]   ;;  %s1793_s10 = inlined_call_operand.vmem [shape: f32[1,32], index: 10, kind: input, shape index: {}]   ;;  %s1794_s11 = inlined_call_operand.vmem [shape: f32[1,32], index: 11, kind: input, shape index: {}]   ;;  %s1795_s12 = inlined_call_operand.vmem [shape: f32[1,32], index: 12, kind: input, shape index: {}]   ;;  %s1796_s13 = inlined_call_operand.vmem [shape: bf16[2,8,32], index: 13, kind: output, shape index: {}]  }
   0x1 LB: > { %s1309_s26 = sadd.s32 4294967295, %s1524_s25   ;;  %p1313_p0 = scmp.ge.s32.totalorder %s1524_s25, 1  ;;  %s1524_s25 = sphi %s1612_s25, %s23_s25  }
   0x2   : > { %p386_p1 = scmp.lt.s32.totalorder %s1524_s25, 3 }
   0x4   : > { %p387_p2 = pnand %p1313_p0, %p386_p1 }
   0x5   : > { %v1487_v0 = vld [vmem:[%s1784_s1] sm:$0xff] (!%p387_p2)   ;;  %v1526_v1 = vmov (!%p387_p2), 0.0   ;;  %v1488_v2 = vld [vmem:[%s1784_s1 + $0x8] sm:$0xff] (!%p387_p2)   ;;  %vm1527_vm0 = vmmov (!%p387_p2), 0   ;;  %p428_p3 = scmp.lt.s32.totalorder (!%p387_p2), %s1309_s26, 1  ;;  %vm463_vm1 = vcmask (!%p387_p2), 261120  }
   0x6   : > { %390 = sbr.rel (%p387_p2) target bundleno = 2568 (0xa08), region = 72  ;;  %1379 = vmatprep.subr.bf16.mxu0 (!%p387_p2), %v1526_v1  ;;  %1387 = vmatprep.subr.bf16.mxu1 (!%p387_p2), %v1526_v1  ;;  %v1317_v5 = vld [vmem:[%s1785_s2] ss:$0 sm:$0xff] (!%p387_p2)  ;;  %s1528_s20 = smov (!%p387_p2), 120   ;;  %vm511_vm2 = vcmask (!%p387_p2), 64512   ;;  %vm576_vm3 = vcmask (!%p387_p2), 1043456  }
   0x7   : > { %1380 = vmatpush3.bf16.msra.mxu0 (!%p387_p2), %v1487_v0  ;;  %1383 = vmatprep.mubr.msk.bf16.mxu0 (!%p387_p2), %vm1527_vm0, %v1526_v1  ;;  %s1529_s21 = smov (!%p387_p2), 96   ;;  %s1530_s22 = smov (!%p387_p2), 80   ;;  %vm736_vm4 = vcmask (!%p387_p2), 130112   ;;  %vm853_vm5 = vcmask (!%p387_p2), 195712   ;;  %vm970_vm6 = vcmask (!%p387_p2), 261312   ;;  %vm1179_vm7 = vcmask (!%p387_p2), 523264  }
   0x8   : > { %1381 = vmatprep.subr.bf16.mxu0 (!%p387_p2), %v1526_v1  ;;  %1389 = vmatprep.mubr.msk.bf16.mxu1 (!%p387_p2), %vm1527_vm0, %v1526_v1  ;;  %s1531_s23 = smov (!%p387_p2), 88   ;;  %s1532_s24 = smov (!%p387_p2), 72   ;;  %vm1254_vm8 = vcmask (!%p387_p2), 257024  }
   0x9   : > { %s1533_s27 = smov (!%p387_p2), 112   ;;  %s1534_s28 = smov (!%p387_p2), 104  }
   0xa   : > { %s1535_s29 = smov (!%p387_p2), 56   ;;  %s1536_s30 = smov (!%p387_p2), 64  }
   0xb   : > { %1382 = vmatpush3.bf16.msra.mxu0 (!%p387_p2), %v1488_v2  ;;  %s1537_s15 = smov (!%p387_p2), 40   ;;  %s1538_s16 = smov (!%p387_p2), 48  }
   0xc   : > { %1393 = vmatprep.subr.bf16.mxu0 (!%p387_p2), %v1526_v1 }
   0xd   : > { %s1798_s26 = smov (!%p428_p3, %s1309_s26), 1 }
   0xe   : > { %s1314_s14 = sshll.u32 %s1798_s26, 2 }
   0xf   : > { %s431_s17 = scalar_lea.vmem %s1783_s0, %s1314_s14 }
  0x10   : > { %v1642_v3 = vld [vmem:[%s431_s17] sm:$0xf]  ;;  %s1539_s17 = smov 8  }
  0x11   : > { %v1316_v4 = vcombine.low %v1642_v3, %v1642_v3 }
  0x13   : > { %1384 = vmatmul.mubr.msk.bf16.vlgmr.msra.gmra.mrb[0].mxu0 %vm463_vm1, %v1316_v4 }
  0x14   : > { %1395 = vmatprep.mubr.msk.bf16.mxu0 %vm1527_vm0, %v1526_v1 }
  0xe6   : > { %v501_v6 = vpop.f32.mrb[0].mxu0 }
  0xe7   : > { %v502_v7 = vadd.f32 %v1317_v5, %v501_v6  ;;  %v1385_v8 = vpop.f32.mrb[1].mxu0 }
  0xe8   : > { %v504_v9 = vpop.f32.mrb[2].mxu0 }
  0xe9   : > { %v1652_v10 = vpack.c.bf16 %v502_v7, %v502_v7  ;;  %v1386_v11 = vpop.f32.mrb[3].mxu0 }
  0xeb   : > { %621 = vrot.lane.b32.xlu1 %v1652_v10, %s1528_s20  ;;  %509 = vrot.lane.b32.xlu0 %v1652_v10, %s1529_s21 }
  0xef   : > { %740 = vrot.lane.b32.xlu1 %v1652_v10, %s1530_s22  ;;  %623 = vrot.lane.b32.xlu0 %v1652_v10, %s1531_s23  ;;  %s1540_s22 = smov 16   ;;  %s1541_s23 = smov 24  }
  0xf3   : > { %857 = vrot.lane.b32.xlu1 %v1652_v10, %s1532_s24  ;;  %738 = vrot.lane.b32.xlu0 %v1652_v10, %s1533_s27  ;;  %s435_s24 = scalar_lea.vmem %s1796_s13, %s1314_s14 }
  0xf7   : > { %855 = vrot.lane.b32.xlu0 %v1652_v10, %s1534_s28 }
 0x15d   : > { %v510_v12 = vpop.permute.xlu0 %509  ;;  %v622_v15 = vpop.permute.xlu1 %621 }
 0x15e   : > { %v516_v13 = vsel %vm511_vm2, %v510_v12, 0 }
 0x15f   : > { %1388 = vmatpush3.bf16.xpose.msra.mxu1 %v516_v13 }
 0x160   : > { %1399 = vmatprep.subr.bf16.mxu1 %v1526_v1 }
 0x161   : > { %v624_v14 = vpop.permute.xlu0 %623  ;;  %v741_v17 = vpop.permute.xlu1 %740 }
 0x162   : > { %v629_v16 = vsel %vm511_vm2, %v624_v14, 0  ;;  %v746_v18 = vsel %vm511_vm2, %v741_v17, 0 }
 0x165   : > { %v858_v19 = vpop.permute.xlu1 %857  ;;  %v739_v20 = vpop.permute.xlu0 %738 }
 0x166   : > { %1390 = vmatmul.mubr.msk.bf16.vlgmr.msra.gmra.mrb[0].mxu1 %vm511_vm2, %v1652_v10  ;;  %v863_v21 = vsel %vm511_vm2, %v858_v19, 0 }
 0x167   : > { %1400 = vmatpush3.bf16.xpose.msra.mxu1 %v629_v16  ;;  %1401 = vmatprep.mubr.msk.bf16.mxu1 %vm1527_vm0, %v1526_v1 }
 0x168   : > { %1411 = vmatprep.subr.bf16.mxu1 %v1526_v1 }
 0x169   : > { %v856_v22 = vpop.permute.xlu0 %855 }
 0x16e   : > { %1402 = vmatmul.mubr.msk.bf16.vlgmr.msra.gmra.mrb[4].mxu1 %vm511_vm2, %v622_v15 }
 0x16f   : > { %1412 = vmatpush3.bf16.xpose.msra.mxu1 %v746_v18  ;;  %1413 = vmatprep.mubr.msk.bf16.mxu1 %vm1527_vm0, %v1526_v1 }
 0x170   : > { %1423 = vmatprep.subr.bf16.mxu1 %v1526_v1 }
 0x176   : > { %1414 = vmatmul.mubr.msk.bf16.vlgmr.msra.gmra.mrb[8].mxu1 %vm511_vm2, %v739_v20 }
 0x177   : > { %1424 = vmatpush3.bf16.xpose.msra.mxu1 %v863_v21  ;;  %1425 = vmatprep.mubr.msk.bf16.mxu1 %vm1527_vm0, %v1526_v1 }
 0x178   : > { %1435 = vmatprep.subr.bf16.mxu1 %v1526_v1 }
 0x17e   : > { %1426 = vmatmul.mubr.msk.bf16.vlgmr.msra.gmra.mrb[12].mxu1 %vm511_vm2, %v856_v22 }
 0x17f   : > { %1439 = vmatprep.mubr.msk.bf16.mxu1 %vm1527_vm0, %v1526_v1 }
 0x239   : > { %v552_v23 = vpop.f32.mrb[0].mxu1 }
 0x23a   : > { %v558_v24 = vmul.f32 0.35355338, %v552_v23  ;;  %v1391_v25 = vpop.f32.mrb[1].mxu1 }
 0x23b   : > { %v555_v26 = vpop.f32.mrb[2].mxu1 }
 0x23c   : > { %v1392_v27 = vpop.f32.mrb[3].mxu1  ;;  %v559_v28 = vsel %vm511_vm2, %v558_v24, -inf }
 0x23d   : > { %560 = vmax.xlane.f32.xlu1 %v559_v28 }
 0x241   : > { %v665_v29 = vpop.f32.mrb[4].mxu1 }
 0x242   : > { %v671_v30 = vmul.f32 0.35355338, %v665_v29  ;;  %v1403_v31 = vpop.f32.mrb[5].mxu1 }
 0x243   : > { %v668_v32 = vpop.f32.mrb[6].mxu1 }
 0x244   : > { %v1404_v33 = vpop.f32.mrb[7].mxu1  ;;  %v672_v34 = vsel %vm511_vm2, %v671_v30, -inf }
 0x245   : > { %673 = vmax.xlane.f32.xlu0 %v672_v34 }
 0x249   : > { %v782_v35 = vpop.f32.mrb[8].mxu1 }
 0x24a   : > { %v788_v36 = vmul.f32 0.35355338, %v782_v35  ;;  %v1415_v37 = vpop.f32.mrb[9].mxu1 }
 0x24b   : > { %v785_v38 = vpop.f32.mrb[10].mxu1  ;;  %v1490_v37 = vld [vmem:[%s1786_s3] sm:$0xff]  }
 0x24c   : > { %v1416_v39 = vpop.f32.mrb[11].mxu1  ;;  %v789_v40 = vsel %vm511_vm2, %v788_v36, -inf  ;;  %1436 = vmatpush3.bf16.msra.mxu1 %v1490_v37  ;;  %v1491_v38 = vld [vmem:[%s1786_s3 + $0x8] sm:$0xff]  }
 0x24d   : > { %790 = vmax.xlane.f32.xlu0 %v789_v40  ;;  %1437 = vmatprep.subr.bf16.mxu1 %v1526_v1 }
 0x250   : > { %1438 = vmatpush3.bf16.msra.mxu1 %v1491_v38 }
 0x251   : > { %v899_v41 = vpop.f32.mrb[12].mxu1  ;;  %1451 = vmatprep.subr.bf16.mxu1 %v1526_v1 }
 0x252   : > { %v905_v42 = vmul.f32 0.35355338, %v899_v41  ;;  %v1427_v43 = vpop.f32.mrb[13].mxu1 }
 0x253   : > { %v902_v44 = vpop.f32.mrb[14].mxu1 }
 0x254   : > { %v1428_v45 = vpop.f32.mrb[15].mxu1  ;;  %v906_v46 = vsel %vm511_vm2, %v905_v42, -inf }
 0x255   : > { %907 = vmax.xlane.f32.xlu1 %v906_v46 }
 0x2ca   : > { %v561_v47 = vpop.xlane.xlu1 %560 }
 0x2cb   : > { %v562_v48 = vsub.f32 %v558_v24, %v561_v47 }
 0x2cd   : > { %v563_v49 = vmul.f32 1.442695, %v562_v48 }
 0x2cf   : > { %1498 = vpow2.f32 %v563_v49 }
 0x2d2   : > { %v674_v50 = vpop.xlane.xlu0 %673 }
 0x2d3   : > { %v675_v51 = vsub.f32 %v671_v30, %v674_v50 }
 0x2d5   : > { %v676_v52 = vmul.f32 1.442695, %v675_v51 }
 0x2d7   : > { %1500 = vpow2.f32 %v676_v52  ;;  %v1329_v52 = vld [vmem:[%s1787_s4] ss:$0 sm:$0xff] }
 0x2d9   : > { %v1499_v53 = vpop.eup %1498 }
 0x2da   : > { %v791_v54 = vpop.xlane.xlu0 %790  ;;  %v565_v55 = vsel %vm511_vm2, %v1499_v53, 0.0 }
 0x2db   : > { %v792_v56 = vsub.f32 %v788_v36, %v791_v54  ;;  %566 = vadd.xlane.f32.xlu0 %v565_v55 }
 0x2dd   : > { %v793_v57 = vmul.f32 1.442695, %v792_v56 }
 0x2df   : > { %1502 = vpow2.f32 %v793_v57 }
 0x2e1   : > { %v1501_v58 = vpop.eup %1500 }
 0x2e2   : > { %v678_v59 = vsel %vm511_vm2, %v1501_v58, 0.0  ;;  %v908_v62 = vpop.xlane.xlu1 %907 }
 0x2e3   : > { %679 = vadd.xlane.f32.xlu1 %v678_v59  ;;  %v909_v63 = vsub.f32 %v905_v42, %v908_v62 }
 0x2e5   : > { %v910_v0 = vmul.f32 1.442695, %v909_v63 }
 0x2e7   : > { %1504 = vpow2.f32 %v910_v0 }
 0x2e9   : > { %v1503_v60 = vpop.eup %1502 }
 0x2ea   : > { %v795_v61 = vsel %vm511_vm2, %v1503_v60, 0.0 }
 0x2eb   : > { %796 = vadd.xlane.f32.xlu0 %v795_v61 }
 0x2f1   : > { %v1505_v2 = vpop.eup %1504 }
 0x2f2   : > { %v912_v4 = vsel %vm511_vm2, %v1505_v2, 0.0 }
 0x2f4   : > { %684 = vrot.lane.b32.xlu1 %v1652_v10, %s1535_s29 }
 0x301   : > { %571 = vrot.lane.b32.xlu0 %v1652_v10, %s1536_s30 }
 0x305   : > { %918 = vrot.lane.b32.xlu0 %v1652_v10, %s1537_s15 }
 0x318   : > { %913 = vadd.xlane.f32.xlu1 %v912_v4  ;;  %v1493_v4 = vld [vmem:[%s1790_s7 + $0x8] sm:$0xff]  }
 0x329   : > { %801 = vrot.lane.b32.xlu1 %v1652_v10, %s1538_s16 }
 0x368   : > { %v567_v5 = vpop.xlane.xlu0 %566 }
 0x369   : > { %1506 = vrcp.f32 %v567_v5  ;;  %v1494_v5 = vld [vmem:[%s1792_s9] sm:$0xff]  }
 0x370   : > { %v680_v6 = vpop.xlane.xlu1 %679 }
 0x371   : > { %1508 = vrcp.f32 %v680_v6  ;;  %v1495_v6 = vld [vmem:[%s1792_s9 + $0x8] sm:$0xff]  }
 0x373   : > { %v1507_v7 = vpop.eup %1506 }
 0x374   : > { %v569_v9 = vmul.f32 %v1507_v7, %v1499_v53  ;;  %v685_v13 = vpop.permute.xlu1 %684  ;;  %v438_v53 = vunpack.c.l.bf16 %v1642_v3  ;;  %v1492_v3 = vld [vmem:[%s1790_s7] sm:$0xff]  }
 0x375   : > { %v690_v16 = vsel %vm576_vm3, %v685_v13, 0 }
 0x376   : > { %v570_v14 = vpack.c.bf16 %v569_v9, %v569_v9 }
 0x378   : > { %v797_v8 = vpop.xlane.xlu0 %796 }
 0x379   : > { %1510 = vrcp.f32 %v797_v8 }
 0x37b   : > { %v1509_v15 = vpop.eup %1508 }
 0x37c   : > { %v572_v11 = vpop.permute.xlu0 %571  ;;  %v682_v10 = vmul.f32 %v1509_v15, %v1501_v58 }
 0x37d   : > { %v578_v12 = vsel %vm576_vm3, %v572_v11, 0 }
 0x37e   : > { %1394 = vmatpush3.bf16.msra.mxu0 %v578_v12  ;;  %v683_v17 = vpack.c.bf16 %v682_v10, %v682_v10  ;;  %v1333_v12 = vld [vmem:[%s1788_s5] ss:$0 sm:$0xff] }
 0x37f   : > { %1405 = vmatprep.subr.bf16.mxu0 %v1526_v1 }
 0x380   : > { %v919_v23 = vpop.permute.xlu0 %918 }
 0x381   : > { %1396 = vmatmul.mubr.msk.bf16.vlgmr.msra.gmra.mrb[4].mxu0 %vm511_vm2, %v570_v14  ;;  %v924_v25 = vsel %vm576_vm3, %v919_v23, 0  ;;  %v1334_v14 = vld [vmem:[%s1789_s6] ss:$0 sm:$0xff] }
 0x382   : > { %1406 = vmatpush3.bf16.msra.mxu0 %v690_v16  ;;  %1407 = vmatprep.mubr.msk.bf16.mxu0 %vm1527_vm0, %v1526_v1 }
 0x383   : > { %1417 = vmatprep.subr.bf16.mxu0 %v1526_v1  ;;  %v1511_v18 = vpop.eup %1510 }
 0x384   : > { %v799_v20 = vmul.f32 %v1511_v18, %v1503_v60  ;;  %v1497_v18 = vld [vmem:[%s1792_s9 + $0x18] sm:$0xff]  }
 0x386   : > { %v800_v24 = vpack.c.bf16 %v799_v20, %v799_v20 }
 0x389   : > { %1408 = vmatmul.mubr.msk.bf16.vlgmr.msra.gmra.mrb[8].mxu0 %vm511_vm2, %v683_v17  ;;  %v1496_v17 = vld [vmem:[%s1792_s9 + $0x10] sm:$0xff]  }
 0x38a   : > { %1419 = vmatprep.mubr.msk.bf16.mxu0 %vm1527_vm0, %v1526_v1 }
 0x3a5   : > { %v914_v19 = vpop.xlane.xlu1 %913 }
 0x3a6   : > { %1512 = vrcp.f32 %v914_v19  ;;  %v1335_v19 = vld [vmem:[%s1791_s8] ss:$0 sm:$0xff] }
 0x3a9   : > { %v802_v21 = vpop.permute.xlu1 %801 }
 0x3aa   : > { %v807_v22 = vsel %vm576_vm3, %v802_v21, 0 }
 0x3ab   : > { %1418 = vmatpush3.bf16.msra.mxu0 %v807_v22 }
 0x3ac   : > { %1429 = vmatprep.subr.bf16.mxu0 %v1526_v1 }
 0x3ae   : > { %1420 = vmatmul.mubr.msk.bf16.vlgmr.msra.gmra.mrb[12].mxu0 %vm511_vm2, %v800_v24 }
 0x3af   : > { %1430 = vmatpush3.bf16.msra.mxu0 %v924_v25  ;;  %1431 = vmatprep.mubr.msk.bf16.mxu0 %vm1527_vm0, %v1526_v1 }
 0x3b0   : > { %v1513_v26 = vpop.eup %1512  ;;  %1443 = vmatprep.subr.bf16.mxu0 %v1526_v1 }
 0x3b1   : > { %v916_v27 = vmul.f32 %v1513_v26, %v1505_v2 }
 0x3b3   : > { %v917_v28 = vpack.c.bf16 %v916_v27, %v916_v27 }
 0x3b6   : > { %1432 = vmatmul.mubr.msk.bf16.vlgmr.msra.gmra.mrb[16].mxu0 %vm511_vm2, %v917_v28 }
 0x3b7   : > { %1447 = vmatprep.mubr.msk.bf16.mxu0 %vm1527_vm0, %v1526_v1  ;;  %1444 = vmatpush3.bf16.msra.mxu0 %v1492_v3 }
 0x3b8   : > { %1445 = vmatprep.subr.bf16.mxu0 %v1526_v1 }
 0x3bb   : > { %1446 = vmatpush3.bf16.msra.mxu0 %v1493_v4 }
 0x454   : > { %v614_v29 = vpop.f32.mrb[4].mxu0 }
 0x455   : > { %620 = vst.msk [vmem:[#allocation2] sm:$0xff] %vm511_vm2, %v614_v29  ;;  %v1397_v30 = vpop.f32.mrb[5].mxu0 }
 0x456   : > { %v617_v31 = vpop.f32.mrb[6].mxu0 }
 0x457   : > { %v1398_v32 = vpop.f32.mrb[7].mxu0 }
 0x45c   : > { %v726_v33 = vpop.f32.mrb[8].mxu0 }
 0x45d   : > { %733 = vrot.lane.b32.xlu1 %v726_v33, %s1539_s17  ;;  %v1409_v34 = vpop.f32.mrb[9].mxu0 }
 0x45e   : > { %v729_v35 = vpop.f32.mrb[10].mxu0 }
 0x45f   : > { %v1410_v36 = vpop.f32.mrb[11].mxu0 }
 0x481   : > { %v843_v39 = vpop.f32.mrb[12].mxu0 }
 0x482   : > { %850 = vrot.lane.b32.xlu0 %v843_v39, %s1540_s22  ;;  %v1421_v40 = vpop.f32.mrb[13].mxu0 }
 0x483   : > { %v846_v41 = vpop.f32.mrb[14].mxu0 }
 0x484   : > { %v1422_v42 = vpop.f32.mrb[15].mxu0 }
 0x489   : > { %v960_v43 = vpop.f32.mrb[16].mxu0 }
 0x48a   : > { %967 = vrot.lane.b32.xlu1 %v960_v43, %s1541_s23  ;;  %v1433_v44 = vpop.f32.mrb[17].mxu0  ;;  %v1345_v43 = vld [vmem:[%s1794_s11] ss:$0 sm:$0xff] }
 0x48b   : > { %v963_v45 = vpop.f32.mrb[18].mxu0 }
 0x48c   : > { %v1434_v46 = vpop.f32.mrb[19].mxu0  ;;  %v1346_v45 = vld [vmem:[%s1795_s12] ss:$0 sm:$0xff] }
 0x4cf   : > { %v734_v47 = vpop.permute.xlu1 %733 }
 0x4d0   : > { %737 = vst.msk [vmem:[#allocation2] sm:$0xff] %vm736_vm4, %v734_v47 }
 0x4f4   : > { %v851_v48 = vpop.permute.xlu0 %850 }
 0x4f5   : > { %854 = vst.msk [vmem:[#allocation2] sm:$0xff] %vm853_vm5, %v851_v48 }
 0x4fc   : > { %v968_v49 = vpop.permute.xlu1 %967 }
 0x4fd   : > { %971 = vst.msk [vmem:[#allocation2] sm:$0xff] %vm970_vm6, %v968_v49 }
 0x504   : > { %v972_v50 = vld [vmem:[#allocation2] sm:$0xff] }
 0x505   : > { %v973_v51 = vpack.c.bf16 %v972_v50, %v972_v50 }
 0x507   : > { %1440 = vmatmul.mubr.msk.bf16.vlgmr.msra.gmra.mrb[16].mxu1 %vm463_vm1, %v973_v51 }
 0x508   : > { %1459 = vmatprep.mubr.msk.bf16.mxu1 %vm1527_vm0, %v1526_v1  ;;  %1452 = vmatpush3.bf16.msra.mxu1 %v1494_v5 }
 0x509   : > { %1453 = vmatprep.subr.bf16.mxu1 %v1526_v1 }
 0x50c   : > { %1454 = vmatpush3.bf16.msra.mxu1 %v1495_v6 }
 0x50d   : > { %1455 = vmatprep.subr.bf16.mxu1 %v1526_v1 }
 0x510   : > { %1456 = vmatpush3.bf16.msra.mxu1 %v1496_v17 }
 0x511   : > { %1457 = vmatprep.subr.bf16.mxu1 %v1526_v1  ;;  %v1339_v1 = vld [vmem:[%s1793_s10] ss:$0 sm:$0xff] }
 0x514   : > { %1458 = vmatpush3.bf16.msra.mxu1 %v1497_v18 }
 0x5da   : > { %v1034_v54 = vpop.f32.mrb[16].mxu1 }
 0x5db   : > { %v1035_v55 = vadd.f32 %v1329_v52, %v1034_v54  ;;  %v1441_v56 = vpop.f32.mrb[17].mxu1 }
 0x5dc   : > { %v1037_v57 = vpop.f32.mrb[18].mxu1 }
 0x5dd   : > { %v1442_v58 = vpop.f32.mrb[19].mxu1  ;;  %v1040_v59 = vadd.f32 %v1035_v55, %v438_v53 }
 0x5df   : > { %v1041_v60 = vsel %vm463_vm1, %v1040_v59, 0.0 }
 0x5e0   : > { %1042 = vadd.xlane.f32.xlu0 %v1041_v60 }
 0x66d   : > { %v1043_v61 = vpop.xlane.xlu0 %1042 }
 0x66e   : > { %v1045_v62 = vmul.f32 0.03125, %v1043_v61 }
 0x670   : > { %v1046_v63 = vsub.f32 %v1040_v59, %v1045_v62 }
 0x672   : > { %v1047_v0 = vmul.f32 %v1046_v63, %v1046_v63 }
 0x674   : > { %v1048_v2 = vsel %vm463_vm1, %v1047_v0, 0.0 }
 0x675   : > { %1049 = vadd.xlane.f32.xlu1 %v1048_v2 }
 0x702   : > { %v1050_v7 = vpop.xlane.xlu1 %1049 }
 0x703   : > { %v1051_v8 = vmul.f32 0.03125, %v1050_v7 }
 0x705   : > { %v1052_v9 = vadd.f32 1e-05, %v1051_v8 }
 0x707   : > { %1514 = vrsqrt.f32 %v1052_v9 }
 0x711   : > { %v1515_v11 = vpop.eup %1514 }
 0x712   : > { %v1054_v13 = vmul.f32 %v1515_v11, %v1046_v63 }
 0x714   : > { %v1062_v15 = vmul.f32 %v1333_v12, %v1054_v13 }
 0x716   : > { %v1070_v16 = vadd.f32 %v1334_v14, %v1062_v15 }
 0x718   : > { %v1071_v10 = vpack.c.bf16 %v1070_v16, %v1070_v16 }
 0x71a   : > { %1448 = vmatmul.mubr.msk.bf16.vlgmr.msra.gmra.mrb[20].mxu0 %vm463_vm1, %v1071_v10 }
 0x7ed   : > { %v1132_v20 = vpop.f32.mrb[20].mxu0 }
 0x7ee   : > { %v1133_v21 = vadd.f32 %v1335_v19, %v1132_v20  ;;  %v1449_v22 = vpop.f32.mrb[21].mxu0 }
 0x7ef   : > { %v1135_v23 = vpop.f32.mrb[22].mxu0 }
 0x7f0   : > { %v1138_v24 = vmax.f32 %v1133_v21, 0.0  ;;  %v1450_v25 = vpop.f32.mrb[23].mxu0 }
 0x7f2   : > { %v1139_v26 = vpack.c.bf16 %v1138_v24, %v1138_v24 }
 0x7f4   : > { %1460 = vmatmul.mubr.msk.bf16.vlgmr.msra.gmra.mrb[20].mxu1 %vm1179_vm7, %v1139_v26 }
 0x8c7   : > { %v1217_v27 = vpop.f32.mrb[20].mxu1 }
 0x8c8   : > { %v1218_v28 = vadd.f32 %v1339_v1, %v1217_v27  ;;  %v1461_v29 = vpop.f32.mrb[21].mxu1 }
 0x8c9   : > { %v1220_v30 = vpop.f32.mrb[22].mxu1 }
 0x8ca   : > { %v1462_v31 = vpop.f32.mrb[23].mxu1  ;;  %v1223_v32 = vadd.f32 %v1218_v28, %v1070_v16 }
 0x8cc   : > { %v1224_v33 = vsel %vm463_vm1, %v1223_v32, 0.0 }
 0x8cd   : > { %1225 = vadd.xlane.f32.xlu0 %v1224_v33 }
 0x95a   : > { %v1226_v34 = vpop.xlane.xlu0 %1225 }
 0x95b   : > { %v1227_v35 = vmul.f32 0.03125, %v1226_v34 }
 0x95d   : > { %v1228_v36 = vsub.f32 %v1223_v32, %v1227_v35 }
 0x95f   : > { %v1229_v37 = vmul.f32 %v1228_v36, %v1228_v36 }
 0x961   : > { %v1230_v38 = vsel %vm463_vm1, %v1229_v37, 0.0 }
 0x962   : > { %1231 = vadd.xlane.f32.xlu0 %v1230_v38 }
 0x9ef   : > { %v1232_v39 = vpop.xlane.xlu0 %1231 }
 0x9f0   : > { %v1233_v40 = vmul.f32 0.03125, %v1232_v39 }
 0x9f2   : > { %v1234_v41 = vadd.f32 1e-05, %v1233_v40 }
 0x9f4   : > { %1516 = vrsqrt.f32 %v1234_v41 }
 0x9fe   : > { %v1517_v42 = vpop.eup %1516 }
 0x9ff   : > { %v1236_v44 = vmul.f32 %v1517_v42, %v1228_v36 }
 0xa01   : > { %v1244_v46 = vmul.f32 %v1345_v43, %v1236_v44 }
 0xa03   : > { %v1252_v47 = vadd.f32 %v1346_v45, %v1244_v46 }
 0xa05   : > { %v1253_v48 = vpack.c.bf16 %v1252_v47, %v1252_v47 }
 0xa07   : > { %1255 = vst.msk [vmem:[%s435_s24] sm:$0xf] %vm1254_vm8, %v1253_v48 }
 0xa08 PF: > { %s23_s25 = sadd.s32 1, %s1524_s25  }
 0xa09   : > { %p20_p4 = scmp.ge.s32.totalorder %s23_s25, 4  }
 0xa0b   :  { %22 = sbr.rel (!%p20_p4) target bundleno = 1 (0x1), region = 102 }

// kernel: simple_transformer_forward.5
= control target key start
LH: loop header
LB: loop body
LE: loop exit
PB: predicated region body
PF: predicated region fallthrough
CT: control target
= control target key end

     0   :  { %v117_v0 = vmov 0.0   ;;  %vm118_vm0 = vmmov 0   ;;  %vm45_vm1 = vcmask 261120   ;;  %s157_s1 = inlined_call_operand.vmem [shape: bf16[32,128], index: 1, kind: input, shape index: {}]   ;;  %s158_s0 = inlined_call_operand.vmem [shape: bf16[16,32], index: 0, kind: input, shape index: {}]   ;;  %s159_s2 = inlined_call_operand.vmem [shape: f32[1,128], index: 2, kind: input, shape index: {}]   ;;  %s160_s3 = inlined_call_operand.vmem [shape: f32[16,128], index: 3, kind: output, shape index: {}]  }
   0x1   :  { %104 = vmatprep.subr.bf16.mxu0 %v117_v0  ;;  %v114_v1 = vld [vmem:[%s157_s1] sm:$0xff]   ;;  %108 = vmatprep.mubr.msk.bf16.mxu0 %vm118_vm0, %v117_v0  ;;  %v115_v2 = vld [vmem:[%s157_s1 + $0x8] sm:$0xff]  }
   0x2   :  { %105 = vmatpush3.bf16.msra.mxu0 %v114_v1  ;;  %v116_v3 = vld [vmem:[%s158_s0] sm:$0xff]  }
   0x3   :  { %106 = vmatprep.subr.bf16.mxu0 %v117_v0  ;;  %v96_v4 = vld [vmem:[%s159_s2] ss:$0 sm:$0xff] }
   0x6   :  { %107 = vmatpush3.bf16.msra.mxu0 %v115_v2 }
   0x9   :  { %109 = vmatmul.mubr.msk.bf16.vlgmr.msra.gmra.mrb[0].mxu0 %vm45_vm1, %v116_v3 }
  0xdc   :  { %v83_v5 = vpop.f32.mrb[0].mxu0 }
  0xdd   :  { %v84_v6 = vadd.f32 %v96_v4, %v83_v5  ;;  %v110_v7 = vpop.f32.mrb[1].mxu0 }
  0xde   :  { %v86_v8 = vpop.f32.mrb[2].mxu0 }
  0xdf   :  { %90 = vst [vmem:[%s160_s3] sm:$0xff] %v84_v6  ;;  %v87_v9 = vadd.f32 %v96_v4, %v86_v8  ;;  %v111_v10 = vpop.f32.mrb[3].mxu0 }
  0xe1   :  { %91 = vst [vmem:[%s160_s3 + $0x8] sm:$0xff] %v87_v9 }

// kernel: simple_transformer_forward.3
= control target key start
LH: loop header
LB: loop body
LE: loop exit
PB: predicated region body
PF: predicated region fallthrough
CT: control target
= control target key end

     0   :  { %s1612_s25 = smov 0   ;;  %s1783_s0 = inlined_call_operand.vmem [shape: bf16[2,8,32], index: 0, kind: input, shape index: {}]   ;;  %s1784_s1 = inlined_call_operand.vmem [shape: bf16[32,96], index: 1, kind: input, shape index: {}]   ;;  %s1785_s2 = inlined_call_operand.vmem [shape: f32[1,96], index: 2, kind: input, shape index: {}]   ;;  %s1786_s3 = inlined_call_operand.vmem [shape: bf16[32,32], index: 3, kind: input, shape index: {}]   ;;  %s1787_s4 = inlined_call_operand.vmem [shape: f32[1,32], index: 4, kind: input, shape index: {}]   ;;  %s1788_s5 = inlined_call_operand.vmem [shape: f32[1,32], index: 5, kind: input, shape index: {}]   ;;  %s1789_s6 = inlined_call_operand.vmem [shape: f32[1,32], index: 6, kind: input, shape index: {}]   ;;  %s1790_s7 = inlined_call_operand.vmem [shape: bf16[32,64], index: 7, kind: input, shape index: {}]   ;;  %s1791_s8 = inlined_call_operand.vmem [shape: f32[1,64], index: 8, kind: input, shape index: {}]   ;;  %s1792_s9 = inlined_call_operand.vmem [shape: bf16[64,32], index: 9, kind: input, shape index: {}]   ;;  %s1793_s10 = inlined_call_operand.vmem [shape: f32[1,32], index: 10, kind: input, shape index: {}]   ;;  %s1794_s11 = inlined_call_operand.vmem [shape: f32[1,32], index: 11, kind: input, shape index: {}]   ;;  %s1795_s12 = inlined_call_operand.vmem [shape: f32[1,32], index: 12, kind: input, shape index: {}]   ;;  %s1796_s13 = inlined_call_operand.vmem [shape: bf16[2,8,32], index: 13, kind: output, shape index: {}]  }
   0x1 LB: > { %s1309_s26 = sadd.s32 4294967295, %s1524_s25   ;;  %p1313_p0 = scmp.ge.s32.totalorder %s1524_s25, 1  ;;  %s1524_s25 = sphi %s1612_s25, %s23_s25  }
   0x2   : > { %p386_p1 = scmp.lt.s32.totalorder %s1524_s25, 3 }
   0x4   : > { %p387_p2 = pnand %p1313_p0, %p386_p1 }
   0x5   : > { %v1487_v0 = vld [vmem:[%s1784_s1] sm:$0xff] (!%p387_p2)   ;;  %v1526_v1 = vmov (!%p387_p2), 0.0   ;;  %v1488_v2 = vld [vmem:[%s1784_s1 + $0x8] sm:$0xff] (!%p387_p2)   ;;  %vm1527_vm0 = vmmov (!%p387_p2), 0   ;;  %p428_p3 = scmp.lt.s32.totalorder (!%p387_p2), %s1309_s26, 1  ;;  %vm463_vm1 = vcmask (!%p387_p2), 261120  }
   0x6   : > { %390 = sbr.rel (%p387_p2) target bundleno = 2568 (0xa08), region = 72  ;;  %1379 = vmatprep.subr.bf16.mxu0 (!%p387_p2), %v1526_v1  ;;  %1387 = vmatprep.subr.bf16.mxu1 (!%p387_p2), %v1526_v1  ;;  %v1317_v5 = vld [vmem:[%s1785_s2] ss:$0 sm:$0xff] (!%p387_p2)  ;;  %s1528_s20 = smov (!%p387_p2), 120   ;;  %vm511_vm2 = vcmask (!%p387_p2), 64512   ;;  %vm576_vm3 = vcmask (!%p387_p2), 1043456  }
   0x7   : > { %1380 = vmatpush3.bf16.msra.mxu0 (!%p387_p2), %v1487_v0  ;;  %1383 = vmatprep.mubr.msk.bf16.mxu0 (!%p387_p2), %vm1527_vm0, %v1526_v1  ;;  %s1529_s21 = smov (!%p387_p2), 96   ;;  %s1530_s22 = smov (!%p387_p2), 80   ;;  %vm736_vm4 = vcmask (!%p387_p2), 130112   ;;  %vm853_vm5 = vcmask (!%p387_p2), 195712   ;;  %vm970_vm6 = vcmask (!%p387_p2), 261312   ;;  %vm1179_vm7 = vcmask (!%p387_p2), 523264  }
   0x8   : > { %1381 = vmatprep.subr.bf16.mxu0 (!%p387_p2), %v1526_v1  ;;  %1389 = vmatprep.mubr.msk.bf16.mxu1 (!%p387_p2), %vm1527_vm0, %v1526_v1  ;;  %s1531_s23 = smov (!%p387_p2), 88   ;;  %s1532_s24 = smov (!%p387_p2), 72   ;;  %vm1254_vm8 = vcmask (!%p387_p2), 257024  }
   0x9   : > { %s1533_s27 = smov (!%p387_p2), 112   ;;  %s1534_s28 = smov (!%p387_p2), 104  }
   0xa   : > { %s1535_s29 = smov (!%p387_p2), 56   ;;  %s1536_s30 = smov (!%p387_p2), 64  }
   0xb   : > { %1382 = vmatpush3.bf16.msra.mxu0 (!%p387_p2), %v1488_v2  ;;  %s1537_s15 = smov (!%p387_p2), 40   ;;  %s1538_s16 = smov (!%p387_p2), 48  }
   0xc   : > { %1393 = vmatprep.subr.bf16.mxu0 (!%p387_p2), %v1526_v1 }
   0xd   : > { %s1798_s26 = smov (!%p428_p3, %s1309_s26), 1 }
   0xe   : > { %s1314_s14 = sshll.u32 %s1798_s26, 2 }
   0xf   : > { %s431_s17 = scalar_lea.vmem %s1783_s0, %s1314_s14 }
  0x10   : > { %v1642_v3 = vld [vmem:[%s431_s17] sm:$0xf]  ;;  %s1539_s17 = smov 8  }
  0x11   : > { %v1316_v4 = vcombine.low %v1642_v3, %v1642_v3 }
  0x13   : > { %1384 = vmatmul.mubr.msk.bf16.vlgmr.msra.gmra.mrb[0].mxu0 %vm463_vm1, %v1316_v4 }
  0x14   : > { %1395 = vmatprep.mubr.msk.bf16.mxu0 %vm1527_vm0, %v1526_v1 }
  0xe6   : > { %v501_v6 = vpop.f32.mrb[0].mxu0 }
  0xe7   : > { %v502_v7 = vadd.f32 %v1317_v5, %v501_v6  ;;  %v1385_v8 = vpop.f32.mrb[1].mxu0 }
  0xe8   : > { %v504_v9 = vpop.f32.mrb[2].mxu0 }
  0xe9   : > { %v1652_v10 = vpack.c.bf16 %v502_v7, %v502_v7  ;;  %v1386_v11 = vpop.f32.mrb[3].mxu0 }
  0xeb   : > { %621 = vrot.lane.b32.xlu1 %v1652_v10, %s1528_s20  ;;  %509 = vrot.lane.b32.xlu0 %v1652_v10, %s1529_s21 }
  0xef   : > { %740 = vrot.lane.b32.xlu1 %v1652_v10, %s1530_s22  ;;  %623 = vrot.lane.b32.xlu0 %v1652_v10, %s1531_s23  ;;  %s1540_s22 = smov 16   ;;  %s1541_s23 = smov 24  }
  0xf3   : > { %857 = vrot.lane.b32.xlu1 %v1652_v10, %s1532_s24  ;;  %738 = vrot.lane.b32.xlu0 %v1652_v10, %s1533_s27  ;;  %s435_s24 = scalar_lea.vmem %s1796_s13, %s1314_s14 }
  0xf7   : > { %855 = vrot.lane.b32.xlu0 %v1652_v10, %s1534_s28 }
 0x15d   : > { %v510_v12 = vpop.permute.xlu0 %509  ;;  %v622_v15 = vpop.permute.xlu1 %621 }
 0x15e   : > { %v516_v13 = vsel %vm511_vm2, %v510_v12, 0 }
 0x15f   : > { %1388 = vmatpush3.bf16.xpose.msra.mxu1 %v516_v13 }
 0x160   : > { %1399 = vmatprep.subr.bf16.mxu1 %v1526_v1 }
 0x161   : > { %v624_v14 = vpop.permute.xlu0 %623  ;;  %v741_v17 = vpop.permute.xlu1 %740 }
 0x162   : > { %v629_v16 = vsel %vm511_vm2, %v624_v14, 0  ;;  %v746_v18 = vsel %vm511_vm2, %v741_v17, 0 }
 0x165   : > { %v858_v19 = vpop.permute.xlu1 %857  ;;  %v739_v20 = vpop.permute.xlu0 %738 }
 0x166   : > { %1390 = vmatmul.mubr.msk.bf16.vlgmr.msra.gmra.mrb[0].mxu1 %vm511_vm2, %v1652_v10  ;;  %v863_v21 = vsel %vm511_vm2, %v858_v19, 0 }
 0x167   : > { %1400 = vmatpush3.bf16.xpose.msra.mxu1 %v629_v16  ;;  %1401 = vmatprep.mubr.msk.bf16.mxu1 %vm1527_vm0, %v1526_v1 }
 0x168   : > { %1411 = vmatprep.subr.bf16.mxu1 %v1526_v1 }
 0x169   : > { %v856_v22 = vpop.permute.xlu0 %855 }
 0x16e   : > { %1402 = vmatmul.mubr.msk.bf16.vlgmr.msra.gmra.mrb[4].mxu1 %vm511_vm2, %v622_v15 }
 0x16f   : > { %1412 = vmatpush3.bf16.xpose.msra.mxu1 %v746_v18  ;;  %1413 = vmatprep.mubr.msk.bf16.mxu1 %vm1527_vm0, %v1526_v1 }
 0x170   : > { %1423 = vmatprep.subr.bf16.mxu1 %v1526_v1 }
 0x176   : > { %1414 = vmatmul.mubr.msk.bf16.vlgmr.msra.gmra.mrb[8].mxu1 %vm511_vm2, %v739_v20 }
 0x177   : > { %1424 = vmatpush3.bf16.xpose.msra.mxu1 %v863_v21  ;;  %1425 = vmatprep.mubr.msk.bf16.mxu1 %vm1527_vm0, %v1526_v1 }
 0x178   : > { %1435 = vmatprep.subr.bf16.mxu1 %v1526_v1 }
 0x17e   : > { %1426 = vmatmul.mubr.msk.bf16.vlgmr.msra.gmra.mrb[12].mxu1 %vm511_vm2, %v856_v22 }
 0x17f   : > { %1439 = vmatprep.mubr.msk.bf16.mxu1 %vm1527_vm0, %v1526_v1 }
 0x239   : > { %v552_v23 = vpop.f32.mrb[0].mxu1 }
 0x23a   : > { %v558_v24 = vmul.f32 0.35355338, %v552_v23  ;;  %v1391_v25 = vpop.f32.mrb[1].mxu1 }
 0x23b   : > { %v555_v26 = vpop.f32.mrb[2].mxu1 }
 0x23c   : > { %v1392_v27 = vpop.f32.mrb[3].mxu1  ;;  %v559_v28 = vsel %vm511_vm2, %v558_v24, -inf }
 0x23d   : > { %560 = vmax.xlane.f32.xlu1 %v559_v28 }
 0x241   : > { %v665_v29 = vpop.f32.mrb[4].mxu1 }
 0x242   : > { %v671_v30 = vmul.f32 0.35355338, %v665_v29  ;;  %v1403_v31 = vpop.f32.mrb[5].mxu1 }
 0x243   : > { %v668_v32 = vpop.f32.mrb[6].mxu1 }
 0x244   : > { %v1404_v33 = vpop.f32.mrb[7].mxu1  ;;  %v672_v34 = vsel %vm511_vm2, %v671_v30, -inf }
 0x245   : > { %673 = vmax.xlane.f32.xlu0 %v672_v34 }
 0x249   : > { %v782_v35 = vpop.f32.mrb[8].mxu1 }
 0x24a   : > { %v788_v36 = vmul.f32 0.35355338, %v782_v35  ;;  %v1415_v37 = vpop.f32.mrb[9].mxu1 }
 0x24b   : > { %v785_v38 = vpop.f32.mrb[10].mxu1  ;;  %v1490_v37 = vld [vmem:[%s1786_s3] sm:$0xff]  }
 0x24c   : > { %v1416_v39 = vpop.f32.mrb[11].mxu1  ;;  %v789_v40 = vsel %vm511_vm2, %v788_v36, -inf  ;;  %1436 = vmatpush3.bf16.msra.mxu1 %v1490_v37  ;;  %v1491_v38 = vld [vmem:[%s1786_s3 + $0x8] sm:$0xff]  }
 0x24d   : > { %790 = vmax.xlane.f32.xlu0 %v789_v40  ;;  %1437 = vmatprep.subr.bf16.mxu1 %v1526_v1 }
 0x250   : > { %1438 = vmatpush3.bf16.msra.mxu1 %v1491_v38 }
 0x251   : > { %v899_v41 = vpop.f32.mrb[12].mxu1  ;;  %1451 = vmatprep.subr.bf16.mxu1 %v1526_v1 }
 0x252   : > { %v905_v42 = vmul.f32 0.35355338, %v899_v41  ;;  %v1427_v43 = vpop.f32.mrb[13].mxu1 }
 0x253   : > { %v902_v44 = vpop.f32.mrb[14].mxu1 }
 0x254   : > { %v1428_v45 = vpop.f32.mrb[15].mxu1  ;;  %v906_v46 = vsel %vm511_vm2, %v905_v42, -inf }
 0x255   : > { %907 = vmax.xlane.f32.xlu1 %v906_v46 }
 0x2ca   : > { %v561_v47 = vpop.xlane.xlu1 %560 }
 0x2cb   : > { %v562_v48 = vsub.f32 %v558_v24, %v561_v47 }
 0x2cd   : > { %v563_v49 = vmul.f32 1.442695, %v562_v48 }
 0x2cf   : > { %1498 = vpow2.f32 %v563_v49 }
 0x2d2   : > { %v674_v50 = vpop.xlane.xlu0 %673 }
 0x2d3   : > { %v675_v51 = vsub.f32 %v671_v30, %v674_v50 }
 0x2d5   : > { %v676_v52 = vmul.f32 1.442695, %v675_v51 }
 0x2d7   : > { %1500 = vpow2.f32 %v676_v52  ;;  %v1329_v52 = vld [vmem:[%s1787_s4] ss:$0 sm:$0xff] }
 0x2d9   : > { %v1499_v53 = vpop.eup %1498 }
 0x2da   : > { %v791_v54 = vpop.xlane.xlu0 %790  ;;  %v565_v55 = vsel %vm511_vm2, %v1499_v53, 0.0 }
 0x2db   : > { %v792_v56 = vsub.f32 %v788_v36, %v791_v54  ;;  %566 = vadd.xlane.f32.xlu0 %v565_v55 }
 0x2dd   : > { %v793_v57 = vmul.f32 1.442695, %v792_v56 }
 0x2df   : > { %1502 = vpow2.f32 %v793_v57 }
 0x2e1   : > { %v1501_v58 = vpop.eup %1500 }
 0x2e2   : > { %v678_v59 = vsel %vm511_vm2, %v1501_v58, 0.0  ;;  %v908_v62 = vpop.xlane.xlu1 %907 }
 0x2e3   : > { %679 = vadd.xlane.f32.xlu1 %v678_v59  ;;  %v909_v63 = vsub.f32 %v905_v42, %v908_v62 }
 0x2e5   : > { %v910_v0 = vmul.f32 1.442695, %v909_v63 }
 0x2e7   : > { %1504 = vpow2.f32 %v910_v0 }
 0x2e9   : > { %v1503_v60 = vpop.eup %1502 }
 0x2ea   : > { %v795_v61 = vsel %vm511_vm2, %v1503_v60, 0.0 }
 0x2eb   : > { %796 = vadd.xlane.f32.xlu0 %v795_v61 }
 0x2f1   : > { %v1505_v2 = vpop.eup %1504 }
 0x2f2   : > { %v912_v4 = vsel %vm511_vm2, %v1505_v2, 0.0 }
 0x2f4   : > { %684 = vrot.lane.b32.xlu1 %v1652_v10, %s1535_s29 }
 0x301   : > { %571 = vrot.lane.b32.xlu0 %v1652_v10, %s1536_s30 }
 0x305   : > { %918 = vrot.lane.b32.xlu0 %v1652_v10, %s1537_s15 }
 0x318   : > { %913 = vadd.xlane.f32.xlu1 %v912_v4  ;;  %v1493_v4 = vld [vmem:[%s1790_s7 + $0x8] sm:$0xff]  }
 0x329   : > { %801 = vrot.lane.b32.xlu1 %v1652_v10, %s1538_s16 }
 0x368   : > { %v567_v5 = vpop.xlane.xlu0 %566 }
 0x369   : > { %1506 = vrcp.f32 %v567_v5  ;;  %v1494_v5 = vld [vmem:[%s1792_s9] sm:$0xff]  }
 0x370   : > { %v680_v6 = vpop.xlane.xlu1 %679 }
 0x371   : > { %1508 = vrcp.f32 %v680_v6  ;;  %v1495_v6 = vld [vmem:[%s1792_s9 + $0x8] sm:$0xff]  }
 0x373   : > { %v1507_v7 = vpop.eup %1506 }
 0x374   : > { %v569_v9 = vmul.f32 %v1507_v7, %v1499_v53  ;;  %v685_v13 = vpop.permute.xlu1 %684  ;;  %v438_v53 = vunpack.c.l.bf16 %v1642_v3  ;;  %v1492_v3 = vld [vmem:[%s1790_s7] sm:$0xff]  }
 0x375   : > { %v690_v16 = vsel %vm576_vm3, %v685_v13, 0 }
 0x376   : > { %v570_v14 = vpack.c.bf16 %v569_v9, %v569_v9 }
 0x378   : > { %v797_v8 = vpop.xlane.xlu0 %796 }
 0x379   : > { %1510 = vrcp.f32 %v797_v8 }
 0x37b   : > { %v1509_v15 = vpop.eup %1508 }
 0x37c   : > { %v572_v11 = vpop.permute.xlu0 %571  ;;  %v682_v10 = vmul.f32 %v1509_v15, %v1501_v58 }
 0x37d   : > { %v578_v12 = vsel %vm576_vm3, %v572_v11, 0 }
 0x37e   : > { %1394 = vmatpush3.bf16.msra.mxu0 %v578_v12  ;;  %v683_v17 = vpack.c.bf16 %v682_v10, %v682_v10  ;;  %v1333_v12 = vld [vmem:[%s1788_s5] ss:$0 sm:$0xff] }
 0x37f   : > { %1405 = vmatprep.subr.bf16.mxu0 %v1526_v1 }
 0x380   : > { %v919_v23 = vpop.permute.xlu0 %918 }
 0x381   : > { %1396 = vmatmul.mubr.msk.bf16.vlgmr.msra.gmra.mrb[4].mxu0 %vm511_vm2, %v570_v14  ;;  %v924_v25 = vsel %vm576_vm3, %v919_v23, 0  ;;  %v1334_v14 = vld [vmem:[%s1789_s6] ss:$0 sm:$0xff] }
 0x382   : > { %1406 = vmatpush3.bf16.msra.mxu0 %v690_v16  ;;  %1407 = vmatprep.mubr.msk.bf16.mxu0 %vm1527_vm0, %v1526_v1 }
 0x383   : > { %1417 = vmatprep.subr.bf16.mxu0 %v1526_v1  ;;  %v1511_v18 = vpop.eup %1510 }
 0x384   : > { %v799_v20 = vmul.f32 %v1511_v18, %v1503_v60  ;;  %v1497_v18 = vld [vmem:[%s1792_s9 + $0x18] sm:$0xff]  }
 0x386   : > { %v800_v24 = vpack.c.bf16 %v799_v20, %v799_v20 }
 0x389   : > { %1408 = vmatmul.mubr.msk.bf16.vlgmr.msra.gmra.mrb[8].mxu0 %vm511_vm2, %v683_v17  ;;  %v1496_v17 = vld [vmem:[%s1792_s9 + $0x10] sm:$0xff]  }
 0x38a   : > { %1419 = vmatprep.mubr.msk.bf16.mxu0 %vm1527_vm0, %v1526_v1 }
 0x3a5   : > { %v914_v19 = vpop.xlane.xlu1 %913 }
 0x3a6   : > { %1512 = vrcp.f32 %v914_v19  ;;  %v1335_v19 = vld [vmem:[%s1791_s8] ss:$0 sm:$0xff] }
 0x3a9   : > { %v802_v21 = vpop.permute.xlu1 %801 }
 0x3aa   : > { %v807_v22 = vsel %vm576_vm3, %v802_v21, 0 }
 0x3ab   : > { %1418 = vmatpush3.bf16.msra.mxu0 %v807_v22 }
 0x3ac   : > { %1429 = vmatprep.subr.bf16.mxu0 %v1526_v1 }
 0x3ae   : > { %1420 = vmatmul.mubr.msk.bf16.vlgmr.msra.gmra.mrb[12].mxu0 %vm511_vm2, %v800_v24 }
 0x3af   : > { %1430 = vmatpush3.bf16.msra.mxu0 %v924_v25  ;;  %1431 = vmatprep.mubr.msk.bf16.mxu0 %vm1527_vm0, %v1526_v1 }
 0x3b0   : > { %v1513_v26 = vpop.eup %1512  ;;  %1443 = vmatprep.subr.bf16.mxu0 %v1526_v1 }
 0x3b1   : > { %v916_v27 = vmul.f32 %v1513_v26, %v1505_v2 }
 0x3b3   : > { %v917_v28 = vpack.c.bf16 %v916_v27, %v916_v27 }
 0x3b6   : > { %1432 = vmatmul.mubr.msk.bf16.vlgmr.msra.gmra.mrb[16].mxu0 %vm511_vm2, %v917_v28 }
 0x3b7   : > { %1447 = vmatprep.mubr.msk.bf16.mxu0 %vm1527_vm0, %v1526_v1  ;;  %1444 = vmatpush3.bf16.msra.mxu0 %v1492_v3 }
 0x3b8   : > { %1445 = vmatprep.subr.bf16.mxu0 %v1526_v1 }
 0x3bb   : > { %1446 = vmatpush3.bf16.msra.mxu0 %v1493_v4 }
 0x454   : > { %v614_v29 = vpop.f32.mrb[4].mxu0 }
 0x455   : > { %620 = vst.msk [vmem:[#allocation2] sm:$0xff] %vm511_vm2, %v614_v29  ;;  %v1397_v30 = vpop.f32.mrb[5].mxu0 }
 0x456   : > { %v617_v31 = vpop.f32.mrb[6].mxu0 }
 0x457   : > { %v1398_v32 = vpop.f32.mrb[7].mxu0 }
 0x45c   : > { %v726_v33 = vpop.f32.mrb[8].mxu0 }
 0x45d   : > { %733 = vrot.lane.b32.xlu1 %v726_v33, %s1539_s17  ;;  %v1409_v34 = vpop.f32.mrb[9].mxu0 }
 0x45e   : > { %v729_v35 = vpop.f32.mrb[10].mxu0 }
 0x45f   : > { %v1410_v36 = vpop.f32.mrb[11].mxu0 }
 0x481   : > { %v843_v39 = vpop.f32.mrb[12].mxu0 }
 0x482   : > { %850 = vrot.lane.b32.xlu0 %v843_v39, %s1540_s22  ;;  %v1421_v40 = vpop.f32.mrb[13].mxu0 }
 0x483   : > { %v846_v41 = vpop.f32.mrb[14].mxu0 }
 0x484   : > { %v1422_v42 = vpop.f32.mrb[15].mxu0 }
 0x489   : > { %v960_v43 = vpop.f32.mrb[16].mxu0 }
 0x48a   : > { %967 = vrot.lane.b32.xlu1 %v960_v43, %s1541_s23  ;;  %v1433_v44 = vpop.f32.mrb[17].mxu0  ;;  %v1345_v43 = vld [vmem:[%s1794_s11] ss:$0 sm:$0xff] }
 0x48b   : > { %v963_v45 = vpop.f32.mrb[18].mxu0 }
 0x48c   : > { %v1434_v46 = vpop.f32.mrb[19].mxu0  ;;  %v1346_v45 = vld [vmem:[%s1795_s12] ss:$0 sm:$0xff] }
 0x4cf   : > { %v734_v47 = vpop.permute.xlu1 %733 }
 0x4d0   : > { %737 = vst.msk [vmem:[#allocation2] sm:$0xff] %vm736_vm4, %v734_v47 }
 0x4f4   : > { %v851_v48 = vpop.permute.xlu0 %850 }
 0x4f5   : > { %854 = vst.msk [vmem:[#allocation2] sm:$0xff] %vm853_vm5, %v851_v48 }
 0x4fc   : > { %v968_v49 = vpop.permute.xlu1 %967 }
 0x4fd   : > { %971 = vst.msk [vmem:[#allocation2] sm:$0xff] %vm970_vm6, %v968_v49 }
 0x504   : > { %v972_v50 = vld [vmem:[#allocation2] sm:$0xff] }
 0x505   : > { %v973_v51 = vpack.c.bf16 %v972_v50, %v972_v50 }
 0x507   : > { %1440 = vmatmul.mubr.msk.bf16.vlgmr.msra.gmra.mrb[16].mxu1 %vm463_vm1, %v973_v51 }
 0x508   : > { %1459 = vmatprep.mubr.msk.bf16.mxu1 %vm1527_vm0, %v1526_v1  ;;  %1452 = vmatpush3.bf16.msra.mxu1 %v1494_v5 }
 0x509   : > { %1453 = vmatprep.subr.bf16.mxu1 %v1526_v1 }
 0x50c   : > { %1454 = vmatpush3.bf16.msra.mxu1 %v1495_v6 }
 0x50d   : > { %1455 = vmatprep.subr.bf16.mxu1 %v1526_v1 }
 0x510   : > { %1456 = vmatpush3.bf16.msra.mxu1 %v1496_v17 }
 0x511   : > { %1457 = vmatprep.subr.bf16.mxu1 %v1526_v1  ;;  %v1339_v1 = vld [vmem:[%s1793_s10] ss:$0 sm:$0xff] }
 0x514   : > { %1458 = vmatpush3.bf16.msra.mxu1 %v1497_v18 }
 0x5da   : > { %v1034_v54 = vpop.f32.mrb[16].mxu1 }
 0x5db   : > { %v1035_v55 = vadd.f32 %v1329_v52, %v1034_v54  ;;  %v1441_v56 = vpop.f32.mrb[17].mxu1 }
 0x5dc   : > { %v1037_v57 = vpop.f32.mrb[18].mxu1 }
 0x5dd   : > { %v1442_v58 = vpop.f32.mrb[19].mxu1  ;;  %v1040_v59 = vadd.f32 %v1035_v55, %v438_v53 }
 0x5df   : > { %v1041_v60 = vsel %vm463_vm1, %v1040_v59, 0.0 }
 0x5e0   : > { %1042 = vadd.xlane.f32.xlu0 %v1041_v60 }
 0x66d   : > { %v1043_v61 = vpop.xlane.xlu0 %1042 }
 0x66e   : > { %v1045_v62 = vmul.f32 0.03125, %v1043_v61 }
 0x670   : > { %v1046_v63 = vsub.f32 %v1040_v59, %v1045_v62 }
 0x672   : > { %v1047_v0 = vmul.f32 %v1046_v63, %v1046_v63 }
 0x674   : > { %v1048_v2 = vsel %vm463_vm1, %v1047_v0, 0.0 }
 0x675   : > { %1049 = vadd.xlane.f32.xlu1 %v1048_v2 }
 0x702   : > { %v1050_v7 = vpop.xlane.xlu1 %1049 }
 0x703   : > { %v1051_v8 = vmul.f32 0.03125, %v1050_v7 }
 0x705   : > { %v1052_v9 = vadd.f32 1e-05, %v1051_v8 }
 0x707   : > { %1514 = vrsqrt.f32 %v1052_v9 }
 0x711   : > { %v1515_v11 = vpop.eup %1514 }
 0x712   : > { %v1054_v13 = vmul.f32 %v1515_v11, %v1046_v63 }
 0x714   : > { %v1062_v15 = vmul.f32 %v1333_v12, %v1054_v13 }
 0x716   : > { %v1070_v16 = vadd.f32 %v1334_v14, %v1062_v15 }
 0x718   : > { %v1071_v10 = vpack.c.bf16 %v1070_v16, %v1070_v16 }
 0x71a   : > { %1448 = vmatmul.mubr.msk.bf16.vlgmr.msra.gmra.mrb[20].mxu0 %vm463_vm1, %v1071_v10 }
 0x7ed   : > { %v1132_v20 = vpop.f32.mrb[20].mxu0 }
 0x7ee   : > { %v1133_v21 = vadd.f32 %v1335_v19, %v1132_v20  ;;  %v1449_v22 = vpop.f32.mrb[21].mxu0 }
 0x7ef   : > { %v1135_v23 = vpop.f32.mrb[22].mxu0 }
 0x7f0   : > { %v1138_v24 = vmax.f32 %v1133_v21, 0.0  ;;  %v1450_v25 = vpop.f32.mrb[23].mxu0 }
 0x7f2   : > { %v1139_v26 = vpack.c.bf16 %v1138_v24, %v1138_v24 }
 0x7f4   : > { %1460 = vmatmul.mubr.msk.bf16.vlgmr.msra.gmra.mrb[20].mxu1 %vm1179_vm7, %v1139_v26 }
 0x8c7   : > { %v1217_v27 = vpop.f32.mrb[20].mxu1 }
 0x8c8   : > { %v1218_v28 = vadd.f32 %v1339_v1, %v1217_v27  ;;  %v1461_v29 = vpop.f32.mrb[21].mxu1 }
 0x8c9   : > { %v1220_v30 = vpop.f32.mrb[22].mxu1 }
 0x8ca   : > { %v1462_v31 = vpop.f32.mrb[23].mxu1  ;;  %v1223_v32 = vadd.f32 %v1218_v28, %v1070_v16 }
 0x8cc   : > { %v1224_v33 = vsel %vm463_vm1, %v1223_v32, 0.0 }
 0x8cd   : > { %1225 = vadd.xlane.f32.xlu0 %v1224_v33 }
 0x95a   : > { %v1226_v34 = vpop.xlane.xlu0 %1225 }
 0x95b   : > { %v1227_v35 = vmul.f32 0.03125, %v1226_v34 }
 0x95d   : > { %v1228_v36 = vsub.f32 %v1223_v32, %v1227_v35 }
 0x95f   : > { %v1229_v37 = vmul.f32 %v1228_v36, %v1228_v36 }
 0x961   : > { %v1230_v38 = vsel %vm463_vm1, %v1229_v37, 0.0 }
 0x962   : > { %1231 = vadd.xlane.f32.xlu0 %v1230_v38 }
 0x9ef   : > { %v1232_v39 = vpop.xlane.xlu0 %1231 }
 0x9f0   : > { %v1233_v40 = vmul.f32 0.03125, %v1232_v39 }
 0x9f2   : > { %v1234_v41 = vadd.f32 1e-05, %v1233_v40 }
 0x9f4   : > { %1516 = vrsqrt.f32 %v1234_v41 }
 0x9fe   : > { %v1517_v42 = vpop.eup %1516 }
 0x9ff   : > { %v1236_v44 = vmul.f32 %v1517_v42, %v1228_v36 }
 0xa01   : > { %v1244_v46 = vmul.f32 %v1345_v43, %v1236_v44 }
 0xa03   : > { %v1252_v47 = vadd.f32 %v1346_v45, %v1244_v46 }
 0xa05   : > { %v1253_v48 = vpack.c.bf16 %v1252_v47, %v1252_v47 }
 0xa07   : > { %1255 = vst.msk [vmem:[%s435_s24] sm:$0xf] %vm1254_vm8, %v1253_v48 }
 0xa08 PF: > { %s23_s25 = sadd.s32 1, %s1524_s25  }
 0xa09   : > { %p20_p4 = scmp.ge.s32.totalorder %s23_s25, 4  }
 0xa0b   :  { %22 = sbr.rel (!%p20_p4) target bundleno = 1 (0x1), region = 102 }

</bundles_post_ra>
